<compile_context>
chip_gen: v7x
topology: tpu7x:2x2x1
jax: 0.10.0
libtpu: 0.0.40
codegen_flags: <defaults>
</compile_context>

<pallas_src>
import functools

import jax
import jax.numpy as jnp
from jax import lax
from jax.experimental import pallas as pl
from jax.experimental.pallas import tpu as pltpu

_LANE = 128
_SUBLANE = 8
_MAX_TIME_BLOCK = 64


def _round_up(x, m):
    return (x + m - 1) // m * m


def _pick_unroll(t_blk):
    if t_blk <= 8:
        return t_blk                     # full unroll of a small block
    for u in (8, 4, 2):
        if t_blk % u == 0:
            return u
    return 1


def _sigmoid_eup(v):
    # exp (EUP) + approximate reciprocal (EUP) keeps the activation off the
    # VPU divide path on the serial per-step chain.
    return pl.reciprocal(1.0 + jnp.exp(-v), approx=True)


# -----------------------------------------------------------------------------
# Kernel
# -----------------------------------------------------------------------------
def _gru_estimator_kernel(x_ref,     # (t_blk*B_pad, In)   bf16  one time block
                          h0_ref,    # (B_pad, Hp)         f32   initial hidden
                          wih_ref,   # (In, 3*Hp)          bf16  gate-slab layout
                          whh_ref,   # (Hp, 3*Hp)          bf16  gate-slab layout
                          bih_ref,   # (1, 3*Hp)           f32
                          bhh_ref,   # (1, 3*Hp)           f32
                          wfc_ref,   # (Hp, Op)            bf16
                          bfc_ref,   # (1, Op)             f32
                          out_ref,   # (B_pad, Op)         f32   fc output (padded)
                          hN_ref,    # (B_pad, Hp)         f32   final hidden
                          h_scr,     # (B_pad, Hp)         VMEM scratch (carried)
                          gx_scr,    # (t_blk*B_pad, 3*Hp) VMEM scratch, f32
                          *, t_blk, b_pad, hp, seq_len, has_tail, unroll):
    @pl.when(pl.program_id(0) == 0)
    def _():
        h_scr[...] = h0_ref[...]

    # Hoisted input projection: ONE batched matmul per time block
    # (bf16 operands, f32 accumulate).
    gx_scr[...] = (jnp.dot(x_ref[...], wih_ref[...],
                           preferred_element_type=jnp.float32) + bih_ref[...])

    # Loop-invariant bias broadcast hoisted once per block (3 vregs live).
    bhh = jnp.broadcast_to(bhh_ref[...], (b_pad, 3 * hp))
    block_start = pl.program_id(0) * t_blk

    def step(t, h):
        row = pl.multiple_of(t * b_pad, b_pad)
        gx = gx_scr[pl.ds(row, b_pad), :]                          # (B_pad, 3Hp)
        # whh is read from VMEM inside the dot (not hoisted to a value) so it
        # does not pin ~24 vregs across the loop.
        # TODO(synk): pltpu.matmul_push_rhs once per block + matmul_acc_lhs
        # per step would avoid re-pushing the loop-invariant RHS every step.
        gh = jnp.dot(h.astype(jnp.bfloat16), whh_ref[...],
                     preferred_element_type=jnp.float32) + bhh
        # PyTorch gate order r, z, n.  Each gate is a 128-lane-aligned slab,
        # so gate slicing is free (no cross-lane relayout).
        r = _sigmoid_eup(gx[:, 0:hp] + gh[:, 0:hp])
        z = _sigmoid_eup(gx[:, hp:2 * hp] + gh[:, hp:2 * hp])
        n = jnp.tanh(gx[:, 2 * hp:3 * hp] + r * gh[:, 2 * hp:3 * hp])
        h_new = (1.0 - z) * n + z * h
        if has_tail:
            # Tail guard: padded timesteps past the true sequence length are
            # no-ops on the carried hidden state.
            h_new = jnp.where(block_start + t < seq_len, h_new, h)
        return h_new

    h_scr[...] = lax.fori_loop(0, t_blk, step, h_scr[...], unroll=unroll)

    @pl.when(pl.program_id(0) == pl.num_programs(0) - 1)
    def _():
        h_last = h_scr[...]
        act = jnp.maximum(h_last, 0.0)
        out_ref[...] = (jnp.dot(act.astype(jnp.bfloat16), wfc_ref[...],
                                preferred_element_type=jnp.float32)
                        + bfc_ref[...]).astype(out_ref.dtype)
        hN_ref[...] = h_last.astype(hN_ref.dtype)


# -----------------------------------------------------------------------------
# Jitted wrapper: padding / layout / kernel call / slicing all inside one jit.
# -----------------------------------------------------------------------------
@functools.partial(jax.jit,
                   static_argnames=("hidden_size", "output_size", "t_blk"))
def _gru_estimator_forward(x, h0, wih, whh, bih, bhh, wfc, bfc, *,
                           hidden_size, output_size, t_blk):
    """x: (B, T, In) f32; h0: (B, H) f32. Returns (out (B,Out), h_T (B,H))."""
    B, T, in_size = x.shape
    hp = whh.shape[0]
    three_hp = whh.shape[1]
    op = wfc.shape[1]
    b_pad = _round_up(max(B, 1), _SUBLANE)
    n_blocks = pl.cdiv(T, t_blk)
    t_pad = n_blocks * t_blk

    # (B, T, In) -> (T_pad, B_pad, In) [t major, b minor], bf16, zero tail.
    x_tbi = jnp.zeros((t_pad, b_pad, in_size), jnp.bfloat16)
    x_tbi = x_tbi.at[:T, :B, :].set(
        jnp.transpose(x, (1, 0, 2)).astype(jnp.bfloat16))
    x_slab = x_tbi.reshape(t_pad * b_pad, in_size)

    h0_pad = (jnp.zeros((b_pad, hp), jnp.float32)
              .at[:B, :hidden_size].set(h0.astype(jnp.float32)))

    kernel = functools.partial(
        _gru_estimator_kernel,
        t_blk=t_blk, b_pad=b_pad, hp=hp, seq_len=T,
        has_tail=(t_pad != T), unroll=_pick_unroll(t_blk))

    grid_spec = pltpu.PrefetchScalarGridSpec(
        num_scalar_prefetch=0,
        grid=(n_blocks,),
        in_specs=[
            pl.BlockSpec((t_blk * b_pad, in_size), lambda t: (t, 0)),
            pl.BlockSpec((b_pad, hp), lambda t: (0, 0)),
            pl.BlockSpec((in_size, three_hp), lambda t: (0, 0)),
            pl.BlockSpec((hp, three_hp), lambda t: (0, 0)),
            pl.BlockSpec((1, three_hp), lambda t: (0, 0)),
            pl.BlockSpec((1, three_hp), lambda t: (0, 0)),
            pl.BlockSpec((hp, op), lambda t: (0, 0)),
            pl.BlockSpec((1, op), lambda t: (0, 0)),
        ],
        out_specs=[
            pl.BlockSpec((b_pad, op), lambda t: (0, 0)),
            pl.BlockSpec((b_pad, hp), lambda t: (0, 0)),
        ],
        scratch_shapes=[
            pltpu.VMEM((b_pad, hp), jnp.float32),
            pltpu.VMEM((t_blk * b_pad, three_hp), jnp.float32),
        ],
    )
    out_p, h_p = pl.pallas_call(
        kernel,
        out_shape=(jax.ShapeDtypeStruct((b_pad, op), jnp.float32),
                   jax.ShapeDtypeStruct((b_pad, hp), jnp.float32)),
        grid_spec=grid_spec,
        compiler_params=pltpu.CompilerParams(
            dimension_semantics=("arbitrary",),        # time is a recurrence
            vmem_limit_bytes=32 * 1024 * 1024),
    )(x_slab, h0_pad, wih, whh, bih, bhh, wfc, bfc)
    return out_p[:B, :output_size], h_p[:B, :hidden_size]


# -----------------------------------------------------------------------------
# Module wrapper
# -----------------------------------------------------------------------------
class VelocityEstimatorGRU:
    """JAX/Pallas port of the PyTorch VelocityEstimatorGRU forward pass."""

    def __init__(self, input_size, hidden_size, output_size, key):
        self.input_size = input_size
        self.hidden_size = hidden_size
        self.output_size = output_size
        self.hidden_states = None            # (B, H) for stateful streaming

        H = hidden_size
        k = 1.0 / jnp.sqrt(jnp.float32(H))
        keys = jax.random.split(key, 6)
        u = lambda kk, shape: jax.random.uniform(
            kk, shape, jnp.float32, minval=-k, maxval=k)

        # PyTorch-layout params (reference / checkpoint compatibility), f32.
        self.w_ih = u(keys[0], (3 * H, input_size))     # (3H, In)
        self.w_hh = u(keys[1], (3 * H, H))              # (3H, H)
        self.b_ih = u(keys[2], (3 * H,))
        self.b_hh = u(keys[3], (3 * H,))
        self.w_fc = u(keys[4], (output_size, H))        # (Out, H)
        self.b_fc = u(keys[5], (output_size,))

        # Kernel-layout params: built ONCE. Gate-slab (each gate in its own
        # 128-lane slab), zero-padded; weights in bf16 (MXU operands), biases
        # in f32 (added after the f32-accumulated matmul).
        Hp = _round_up(H, _LANE)
        Op = _round_up(output_size, _LANE)
        self._Hp, self._Op = Hp, Op

        def gate_pad_ih(w):   # (3H, In) -> (In, 3*Hp)
            out = jnp.zeros((w.shape[1], 3 * Hp), jnp.float32)
            for g in range(3):
                out = out.at[:, g * Hp:g * Hp + H].set(
                    w[g * H:(g + 1) * H, :].T)
            return out

        def gate_pad_hh(w):   # (3H, H) -> (Hp, 3*Hp)
            out = jnp.zeros((Hp, 3 * Hp), jnp.float32)
            for g in range(3):
                out = out.at[:H, g * Hp:g * Hp + H].set(
                    w[g * H:(g + 1) * H, :].T)
            return out

        def gate_pad_b(b):    # (3H,) -> (1, 3*Hp)
            out = jnp.zeros((1, 3 * Hp), jnp.float32)
            for g in range(3):
                out = out.at[0, g * Hp:g * Hp + H].set(b[g * H:(g + 1) * H])
            return out

        self._wih_p = gate_pad_ih(self.w_ih).astype(jnp.bfloat16)
        self._whh_p = gate_pad_hh(self.w_hh).astype(jnp.bfloat16)
        self._bih_p = gate_pad_b(self.b_ih)
        self._bhh_p = gate_pad_b(self.b_hh)
        self._wfc_p = (jnp.zeros((Hp, Op), jnp.float32)
                       .at[:H, :output_size].set(self.w_fc.T)
                       ).astype(jnp.bfloat16)
        self._bfc_p = (jnp.zeros((1, Op), jnp.float32)
                       .at[0, :output_size].set(self.b_fc))

    # ---- internal: run kernel on (B, T, In) + (B, H) initial hidden state.
    def _run(self, x_bti, h0_bh, t_blk=None):
        T = int(x_bti.shape[1])
        if t_blk is None:
            t_blk = min(max(T, 1), _MAX_TIME_BLOCK)
        return _gru_estimator_forward(
            jnp.asarray(x_bti, jnp.float32), jnp.asarray(h0_bh, jnp.float32),
            self._wih_p, self._whh_p, self._bih_p, self._bhh_p,
            self._wfc_p, self._bfc_p,
            hidden_size=self.hidden_size, output_size=self.output_size,
            t_blk=t_blk)

    def forward(self, x, batch_mode=True, hidden_states=None):
        H = self.hidden_size
        if batch_mode:
            B = x.shape[0]
            if hidden_states is None:
                h0 = jnp.zeros((B, H), jnp.float32)
            else:
                h0 = jnp.asarray(hidden_states, jnp.float32).reshape(B, H)
            out, _ = self._run(x, h0)
            return out
        else:
            # x: (T, In) -> batch of 1; carry hidden state across calls.
            x_bti = jnp.asarray(x, jnp.float32)[None, :, :]
            h0 = (jnp.zeros((1, H), jnp.float32)
                  if self.hidden_states is None else self.hidden_states)
            out, h_last = self._run(x_bti, h0)
            self.hidden_states = h_last
            return out

    def reset(self, dones=None):
        # Matches the PyTorch spec exactly: full reset, `dones` is ignored.
        self.hidden_states = None


# -----------------------------------------------------------------------------
# Pure-JAX f32 reference (mirrors the PyTorch forward, batch_mode=True)
# -----------------------------------------------------------------------------
def _reference_forward(model, x, h0=None):
    B, T, _ = x.shape
    H = model.hidden_size
    h = jnp.zeros((B, H), jnp.float32) if h0 is None else h0
    for t in range(T):
        gx = x[:, t, :] @ model.w_ih.T + model.b_ih
        gh = h @ model.w_hh.T + model.b_hh
        r = jax.nn.sigmoid(gx[:, :H] + gh[:, :H])
        z = jax.nn.sigmoid(gx[:, H:2 * H] + gh[:, H:2 * H])
        n = jnp.tanh(gx[:, 2 * H:] + r * gh[:, 2 * H:])
        h = (1.0 - z) * n + z * h
    act = jnp.maximum(h, 0.0)
    return act @ model.w_fc.T + model.b_fc


if __name__ == "__main__":
    key = jax.random.PRNGKey(0)
    k_param, k_x, k_x2 = jax.random.split(key, 3)

    input_size, hidden_size, output_size = 16, 32, 3
    B, T = 2, 8

    model = VelocityEstimatorGRU(input_size, hidden_size, output_size, k_param)
    x = jax.random.normal(k_x, (B, T, input_size), jnp.float32)

    # Batch-mode path (bf16 matmul operands -> compare against f32 reference
    # with a bf16-appropriate tolerance).
    out = model.forward(x, batch_mode=True)
    out = jax.block_until_ready(out)
    ref = _reference_forward(model, x)
    assert out.shape == (B, output_size)
    assert jnp.allclose(out, ref, atol=2e-2, rtol=2e-2), "batch-mode mismatch"

    # Tail-guard path: T=10 with a forced small time block (T padded to 12,
    # three grid blocks, last two timesteps are guarded no-ops).
    x_tail = jax.random.normal(k_x2, (B, 10, input_size), jnp.float32)
    h0 = jnp.zeros((B, hidden_size), jnp.float32)
    out_tail, _ = model._run(x_tail, h0, t_blk=4)
    out_tail = jax.block_until_ready(out_tail)
    ref_tail = _reference_forward(model, x_tail)
    assert jnp.allclose(out_tail, ref_tail, atol=2e-2, rtol=2e-2), \
        "tail-guard mismatch"

    # Stateful streaming path: two chunks of the same sequence must match the
    # full-sequence result (hidden state carried through the kernel output).
    model.reset()
    _ = model.forward(x[0, :4], batch_mode=False)
    out_stream = model.forward(x[0, 4:], batch_mode=False)
    out_stream = jax.block_until_ready(out_stream)
    ref_stream = _reference_forward(model, x[0:1])
    assert jnp.allclose(out_stream, ref_stream, atol=2e-2, rtol=2e-2), \
        "streaming-mode mismatch"

    print("KERNEL_OK")
</pallas_src>

<mosaic_0001>
module attributes {stable_mosaic.version = 11 : i64} {
  func.func @_gru_estimator_kernel(%arg0: i32, %arg1: memref<64x16xbf16, #tpu.memory_space<vmem>>, %arg2: memref<8x128xf32, #tpu.memory_space<vmem>>, %arg3: memref<16x384xbf16, #tpu.memory_space<vmem>>, %arg4: memref<128x384xbf16, #tpu.memory_space<vmem>>, %arg5: memref<1x384xf32, #tpu.memory_space<vmem>>, %arg6: memref<1x384xf32, #tpu.memory_space<vmem>>, %arg7: memref<128x128xbf16, #tpu.memory_space<vmem>>, %arg8: memref<1x128xf32, #tpu.memory_space<vmem>>, %arg9: memref<8x128xf32, #tpu.memory_space<vmem>>, %arg10: memref<8x128xf32, #tpu.memory_space<vmem>>, %arg11: memref<8x128xf32, #tpu.memory_space<vmem>>, %arg12: memref<64x384xf32, #tpu.memory_space<vmem>>) attributes {dimension_semantics = [#tpu.dimension_semantics<arbitrary>], iteration_bounds = array<i64: 1>, scalar_prefetch = 0 : i64, scratch_operands = 2 : i64, tpu.core_type = #tpu.core_type<tc>, window_params = [{transform_indices = @transform_0, window_bounds = array<i64: 64, 16>}, {pipeline_mode = #tpu.pipeline_mode<synchronous>, transform_indices = @transform_1, window_bounds = array<i64: 8, 128>}, {pipeline_mode = #tpu.pipeline_mode<synchronous>, transform_indices = @transform_2, window_bounds = array<i64: 16, 384>}, {pipeline_mode = #tpu.pipeline_mode<synchronous>, transform_indices = @transform_3, window_bounds = array<i64: 128, 384>}, {pipeline_mode = #tpu.pipeline_mode<synchronous>, transform_indices = @transform_4, window_bounds = array<i64: 1, 384>}, {pipeline_mode = #tpu.pipeline_mode<synchronous>, transform_indices = @transform_5, window_bounds = array<i64: 1, 384>}, {pipeline_mode = #tpu.pipeline_mode<synchronous>, transform_indices = @transform_6, window_bounds = array<i64: 128, 128>}, {pipeline_mode = #tpu.pipeline_mode<synchronous>, transform_indices = @transform_7, window_bounds = array<i64: 1, 128>}, {pipeline_mode = #tpu.pipeline_mode<synchronous>, transform_indices = @transform_8, window_bounds = array<i64: 8, 128>}, {pipeline_mode = #tpu.pipeline_mode<synchronous>, transform_indices = @transform_9, window_bounds = array<i64: 8, 128>}]} {
    %c0_i32 = arith.constant 0 : i32
    %0 = arith.cmpi eq, %arg0, %c0_i32 : i32
    %1 = arith.extui %0 : i1 to i32
    %c0_i32_0 = arith.constant 0 : i32
    %2 = arith.cmpi ne, %1, %c0_i32_0 : i32
    scf.if %2 {
      %c0_97 = arith.constant 0 : index
      %c0_98 = arith.constant 0 : index
      %306 = vector.load %arg2[%c0_97, %c0_98] : memref<8x128xf32, #tpu.memory_space<vmem>>, vector<8x128xf32>
      %c0_99 = arith.constant 0 : index
      %c0_100 = arith.constant 0 : index
      %307 = vector.load %arg11[%c0_99, %c0_100] : memref<8x128xf32, #tpu.memory_space<vmem>>, vector<8x128xf32>
      tpu.vector_store %arg11[%c0_99, %c0_100], %306 {strides = array<i32>} : memref<8x128xf32, #tpu.memory_space<vmem>>, vector<8x128xf32>,
    } else {
    }
    %c0 = arith.constant 0 : index
    %c0_1 = arith.constant 0 : index
    %3 = vector.load %arg1[%c0, %c0_1] : memref<64x16xbf16, #tpu.memory_space<vmem>>, vector<64x16xbf16>
    %c0_2 = arith.constant 0 : index
    %c0_3 = arith.constant 0 : index
    %4 = vector.load %arg3[%c0_2, %c0_3] : memref<16x384xbf16, #tpu.memory_space<vmem>>, vector<16x384xbf16>
    %cst = arith.constant dense<0.000000e+00> : vector<64x384xf32>
    %5 = tpu.matmul %3, %4, %cst {dimension_numbers = #tpu.dot_dimension_numbers<[1], [0], [0], [1], [0, 0, 1, 1], [], []>} : vector<64x16xbf16>, vector<16x384xbf16>, vector<64x384xf32> -> vector<64x384xf32>
    %c0_4 = arith.constant 0 : index
    %c0_5 = arith.constant 0 : index
    %6 = vector.load %arg5[%c0_4, %c0_5] : memref<1x384xf32, #tpu.memory_space<vmem>>, vector<1x384xf32>
    %7 = vector.broadcast %6 : vector<1x384xf32> to vector<64x384xf32>
    %8 = arith.addf %5, %7 : vector<64x384xf32>
    %c0_6 = arith.constant 0 : index
    %c0_7 = arith.constant 0 : index
    %9 = vector.load %arg12[%c0_6, %c0_7] : memref<64x384xf32, #tpu.memory_space<vmem>>, vector<64x384xf32>
    tpu.vector_store %arg12[%c0_6, %c0_7], %8 {strides = array<i32>} : memref<64x384xf32, #tpu.memory_space<vmem>>, vector<64x384xf32>,
    %c0_8 = arith.constant 0 : index
    %c0_9 = arith.constant 0 : index
    %10 = vector.load %arg6[%c0_8, %c0_9] : memref<1x384xf32, #tpu.memory_space<vmem>>, vector<1x384xf32>
    %11 = vector.shape_cast %10 : vector<1x384xf32> to vector<1x384xf32>
    %12 = vector.broadcast %11 : vector<1x384xf32> to vector<8x384xf32>
    %c0_10 = arith.constant 0 : index
    %c0_11 = arith.constant 0 : index
    %13 = vector.load %arg11[%c0_10, %c0_11] : memref<8x128xf32, #tpu.memory_space<vmem>>, vector<8x128xf32>
    %c0_i32_12 = arith.constant 0 : i32
    %c8_i32 = arith.constant 8 : i32
    %14 = arith.muli %c0_i32_12, %c8_i32 : i32
    %15 = tpu.assume_multiple %14, 8 : i32
    %16 = arith.index_cast %15 : i32 to index
    %c0_13 = arith.constant 0 : index
    %17 = vector.load %arg12[%16, %c0_13] : memref<64x384xf32, #tpu.memory_space<vmem>>, vector<8x384xf32>
    %18 = arith.truncf %13 : vector<8x128xf32> to vector<8x128xbf16>
    %c0_14 = arith.constant 0 : index
    %c0_15 = arith.constant 0 : index
    %19 = vector.load %arg4[%c0_14, %c0_15] : memref<128x384xbf16, #tpu.memory_space<vmem>>, vector<128x384xbf16>
    %cst_16 = arith.constant dense<0.000000e+00> : vector<8x384xf32>
    %20 = tpu.matmul %18, %19, %cst_16 {dimension_numbers = #tpu.dot_dimension_numbers<[1], [0], [0], [1], [0, 0, 1, 1], [], []>} : vector<8x128xbf16>, vector<128x384xbf16>, vector<8x384xf32> -> vector<8x384xf32>
    %21 = arith.addf %20, %12 : vector<8x384xf32>
    %22 = vector.extract_strided_slice %17 {offsets = [0, 0], sizes = [8, 128], strides = [1, 1]} : vector<8x384xf32> to vector<8x128xf32>
    %23 = vector.extract_strided_slice %21 {offsets = [0, 0], sizes = [8, 128], strides = [1, 1]} : vector<8x384xf32> to vector<8x128xf32>
    %24 = arith.addf %22, %23 : vector<8x128xf32>
    %cst_17 = arith.constant 0.000000e+00 : f32
    %25 = vector.broadcast %cst_17 : f32 to vector<8x128xf32>
    %26 = arith.subf %25, %24 : vector<8x128xf32>
    %27 = math.exp %26 : vector<8x128xf32>
    %cst_18 = arith.constant 1.000000e+00 : f32
    %28 = vector.broadcast %cst_18 : f32 to vector<8x128xf32>
    %29 = arith.addf %28, %27 : vector<8x128xf32>
    %30 = tpu.reciprocal %29 {approx = true} : vector<8x128xf32> -> vector<8x128xf32>
    %31 = vector.extract_strided_slice %17 {offsets = [0, 128], sizes = [8, 128], strides = [1, 1]} : vector<8x384xf32> to vector<8x128xf32>
    %32 = vector.extract_strided_slice %21 {offsets = [0, 128], sizes = [8, 128], strides = [1, 1]} : vector<8x384xf32> to vector<8x128xf32>
    %33 = arith.addf %31, %32 : vector<8x128xf32>
    %cst_19 = arith.constant 0.000000e+00 : f32
    %34 = vector.broadcast %cst_19 : f32 to vector<8x128xf32>
    %35 = arith.subf %34, %33 : vector<8x128xf32>
    %36 = math.exp %35 : vector<8x128xf32>
    %cst_20 = arith.constant 1.000000e+00 : f32
    %37 = vector.broadcast %cst_20 : f32 to vector<8x128xf32>
    %38 = arith.addf %37, %36 : vector<8x128xf32>
    %39 = tpu.reciprocal %38 {approx = true} : vector<8x128xf32> -> vector<8x128xf32>
    %40 = vector.extract_strided_slice %17 {offsets = [0, 256], sizes = [8, 128], strides = [1, 1]} : vector<8x384xf32> to vector<8x128xf32>
    %41 = vector.extract_strided_slice %21 {offsets = [0, 256], sizes = [8, 128], strides = [1, 1]} : vector<8x384xf32> to vector<8x128xf32>
    %42 = arith.mulf %30, %41 : vector<8x128xf32>
    %43 = arith.addf %40, %42 : vector<8x128xf32>
    %44 = math.tanh %43 : vector<8x128xf32>
    %cst_21 = arith.constant 1.000000e+00 : f32
    %45 = vector.broadcast %cst_21 : f32 to vector<8x128xf32>
    %46 = arith.subf %45, %39 : vector<8x128xf32>
    %47 = arith.mulf %46, %44 : vector<8x128xf32>
    %48 = arith.mulf %39, %13 : vector<8x128xf32>
    %49 = arith.addf %47, %48 : vector<8x128xf32>
    %c1_i32 = arith.constant 1 : i32
    %c8_i32_22 = arith.constant 8 : i32
    %50 = arith.muli %c1_i32, %c8_i32_22 : i32
    %51 = tpu.assume_multiple %50, 8 : i32
    %52 = arith.index_cast %51 : i32 to index
    %c0_23 = arith.constant 0 : index
    %53 = vector.load %arg12[%52, %c0_23] : memref<64x384xf32, #tpu.memory_space<vmem>>, vector<8x384xf32>
    %54 = arith.truncf %49 : vector<8x128xf32> to vector<8x128xbf16>
    %c0_24 = arith.constant 0 : index
    %c0_25 = arith.constant 0 : index
    %55 = vector.load %arg4[%c0_24, %c0_25] : memref<128x384xbf16, #tpu.memory_space<vmem>>, vector<128x384xbf16>
    %cst_26 = arith.constant dense<0.000000e+00> : vector<8x384xf32>
    %56 = tpu.matmul %54, %55, %cst_26 {dimension_numbers = #tpu.dot_dimension_numbers<[1], [0], [0], [1], [0, 0, 1, 1], [], []>} : vector<8x128xbf16>, vector<128x384xbf16>, vector<8x384xf32> -> vector<8x384xf32>
    %57 = arith.addf %56, %12 : vector<8x384xf32>
    %58 = vector.extract_strided_slice %53 {offsets = [0, 0], sizes = [8, 128], strides = [1, 1]} : vector<8x384xf32> to vector<8x128xf32>
    %59 = vector.extract_strided_slice %57 {offsets = [0, 0], sizes = [8, 128], strides = [1, 1]} : vector<8x384xf32> to vector<8x128xf32>
    %60 = arith.addf %58, %59 : vector<8x128xf32>
    %cst_27 = arith.constant 0.000000e+00 : f32
    %61 = vector.broadcast %cst_27 : f32 to vector<8x128xf32>
    %62 = arith.subf %61, %60 : vector<8x128xf32>
    %63 = math.exp %62 : vector<8x128xf32>
    %cst_28 = arith.constant 1.000000e+00 : f32
    %64 = vector.broadcast %cst_28 : f32 to vector<8x128xf32>
    %65 = arith.addf %64, %63 : vector<8x128xf32>
    %66 = tpu.reciprocal %65 {approx = true} : vector<8x128xf32> -> vector<8x128xf32>
    %67 = vector.extract_strided_slice %53 {offsets = [0, 128], sizes = [8, 128], strides = [1, 1]} : vector<8x384xf32> to vector<8x128xf32>
    %68 = vector.extract_strided_slice %57 {offsets = [0, 128], sizes = [8, 128], strides = [1, 1]} : vector<8x384xf32> to vector<8x128xf32>
    %69 = arith.addf %67, %68 : vector<8x128xf32>
    %cst_29 = arith.constant 0.000000e+00 : f32
    %70 = vector.broadcast %cst_29 : f32 to vector<8x128xf32>
    %71 = arith.subf %70, %69 : vector<8x128xf32>
    %72 = math.exp %71 : vector<8x128xf32>
    %cst_30 = arith.constant 1.000000e+00 : f32
    %73 = vector.broadcast %cst_30 : f32 to vector<8x128xf32>
    %74 = arith.addf %73, %72 : vector<8x128xf32>
    %75 = tpu.reciprocal %74 {approx = true} : vector<8x128xf32> -> vector<8x128xf32>
    %76 = vector.extract_strided_slice %53 {offsets = [0, 256], sizes = [8, 128], strides = [1, 1]} : vector<8x384xf32> to vector<8x128xf32>
    %77 = vector.extract_strided_slice %57 {offsets = [0, 256], sizes = [8, 128], strides = [1, 1]} : vector<8x384xf32> to vector<8x128xf32>
    %78 = arith.mulf %66, %77 : vector<8x128xf32>
    %79 = arith.addf %76, %78 : vector<8x128xf32>
    %80 = math.tanh %79 : vector<8x128xf32>
    %cst_31 = arith.constant 1.000000e+00 : f32
    %81 = vector.broadcast %cst_31 : f32 to vector<8x128xf32>
    %82 = arith.subf %81, %75 : vector<8x128xf32>
    %83 = arith.mulf %82, %80 : vector<8x128xf32>
    %84 = arith.mulf %75, %49 : vector<8x128xf32>
    %85 = arith.addf %83, %84 : vector<8x128xf32>
    %c2_i32 = arith.constant 2 : i32
    %c8_i32_32 = arith.constant 8 : i32
    %86 = arith.muli %c2_i32, %c8_i32_32 : i32
    %87 = tpu.assume_multiple %86, 8 : i32
    %88 = arith.index_cast %87 : i32 to index
    %c0_33 = arith.constant 0 : index
    %89 = vector.load %arg12[%88, %c0_33] : memref<64x384xf32, #tpu.memory_space<vmem>>, vector<8x384xf32>
    %90 = arith.truncf %85 : vector<8x128xf32> to vector<8x128xbf16>
    %c0_34 = arith.constant 0 : index
    %c0_35 = arith.constant 0 : index
    %91 = vector.load %arg4[%c0_34, %c0_35] : memref<128x384xbf16, #tpu.memory_space<vmem>>, vector<128x384xbf16>
    %cst_36 = arith.constant dense<0.000000e+00> : vector<8x384xf32>
    %92 = tpu.matmul %90, %91, %cst_36 {dimension_numbers = #tpu.dot_dimension_numbers<[1], [0], [0], [1], [0, 0, 1, 1], [], []>} : vector<8x128xbf16>, vector<128x384xbf16>, vector<8x384xf32> -> vector<8x384xf32>
    %93 = arith.addf %92, %12 : vector<8x384xf32>
    %94 = vector.extract_strided_slice %89 {offsets = [0, 0], sizes = [8, 128], strides = [1, 1]} : vector<8x384xf32> to vector<8x128xf32>
    %95 = vector.extract_strided_slice %93 {offsets = [0, 0], sizes = [8, 128], strides = [1, 1]} : vector<8x384xf32> to vector<8x128xf32>
    %96 = arith.addf %94, %95 : vector<8x128xf32>
    %cst_37 = arith.constant 0.000000e+00 : f32
    %97 = vector.broadcast %cst_37 : f32 to vector<8x128xf32>
    %98 = arith.subf %97, %96 : vector<8x128xf32>
    %99 = math.exp %98 : vector<8x128xf32>
    %cst_38 = arith.constant 1.000000e+00 : f32
    %100 = vector.broadcast %cst_38 : f32 to vector<8x128xf32>
    %101 = arith.addf %100, %99 : vector<8x128xf32>
    %102 = tpu.reciprocal %101 {approx = true} : vector<8x128xf32> -> vector<8x128xf32>
    %103 = vector.extract_strided_slice %89 {offsets = [0, 128], sizes = [8, 128], strides = [1, 1]} : vector<8x384xf32> to vector<8x128xf32>
    %104 = vector.extract_strided_slice %93 {offsets = [0, 128], sizes = [8, 128], strides = [1, 1]} : vector<8x384xf32> to vector<8x128xf32>
    %105 = arith.addf %103, %104 : vector<8x128xf32>
    %cst_39 = arith.constant 0.000000e+00 : f32
    %106 = vector.broadcast %cst_39 : f32 to vector<8x128xf32>
    %107 = arith.subf %106, %105 : vector<8x128xf32>
    %108 = math.exp %107 : vector<8x128xf32>
    %cst_40 = arith.constant 1.000000e+00 : f32
    %109 = vector.broadcast %cst_40 : f32 to vector<8x128xf32>
    %110 = arith.addf %109, %108 : vector<8x128xf32>
    %111 = tpu.reciprocal %110 {approx = true} : vector<8x128xf32> -> vector<8x128xf32>
    %112 = vector.extract_strided_slice %89 {offsets = [0, 256], sizes = [8, 128], strides = [1, 1]} : vector<8x384xf32> to vector<8x128xf32>
    %113 = vector.extract_strided_slice %93 {offsets = [0, 256], sizes = [8, 128], strides = [1, 1]} : vector<8x384xf32> to vector<8x128xf32>
    %114 = arith.mulf %102, %113 : vector<8x128xf32>
    %115 = arith.addf %112, %114 : vector<8x128xf32>
    %116 = math.tanh %115 : vector<8x128xf32>
    %cst_41 = arith.constant 1.000000e+00 : f32
    %117 = vector.broadcast %cst_41 : f32 to vector<8x128xf32>
    %118 = arith.subf %117, %111 : vector<8x128xf32>
    %119 = arith.mulf %118, %116 : vector<8x128xf32>
    %120 = arith.mulf %111, %85 : vector<8x128xf32>
    %121 = arith.addf %119, %120 : vector<8x128xf32>
    %c3_i32 = arith.constant 3 : i32
    %c8_i32_42 = arith.constant 8 : i32
    %122 = arith.muli %c3_i32, %c8_i32_42 : i32
    %123 = tpu.assume_multiple %122, 8 : i32
    %124 = arith.index_cast %123 : i32 to index
    %c0_43 = arith.constant 0 : index
    %125 = vector.load %arg12[%124, %c0_43] : memref<64x384xf32, #tpu.memory_space<vmem>>, vector<8x384xf32>
    %126 = arith.truncf %121 : vector<8x128xf32> to vector<8x128xbf16>
    %c0_44 = arith.constant 0 : index
    %c0_45 = arith.constant 0 : index
    %127 = vector.load %arg4[%c0_44, %c0_45] : memref<128x384xbf16, #tpu.memory_space<vmem>>, vector<128x384xbf16>
    %cst_46 = arith.constant dense<0.000000e+00> : vector<8x384xf32>
    %128 = tpu.matmul %126, %127, %cst_46 {dimension_numbers = #tpu.dot_dimension_numbers<[1], [0], [0], [1], [0, 0, 1, 1], [], []>} : vector<8x128xbf16>, vector<128x384xbf16>, vector<8x384xf32> -> vector<8x384xf32>
    %129 = arith.addf %128, %12 : vector<8x384xf32>
    %130 = vector.extract_strided_slice %125 {offsets = [0, 0], sizes = [8, 128], strides = [1, 1]} : vector<8x384xf32> to vector<8x128xf32>
    %131 = vector.extract_strided_slice %129 {offsets = [0, 0], sizes = [8, 128], strides = [1, 1]} : vector<8x384xf32> to vector<8x128xf32>
    %132 = arith.addf %130, %131 : vector<8x128xf32>
    %cst_47 = arith.constant 0.000000e+00 : f32
    %133 = vector.broadcast %cst_47 : f32 to vector<8x128xf32>
    %134 = arith.subf %133, %132 : vector<8x128xf32>
    %135 = math.exp %134 : vector<8x128xf32>
    %cst_48 = arith.constant 1.000000e+00 : f32
    %136 = vector.broadcast %cst_48 : f32 to vector<8x128xf32>
    %137 = arith.addf %136, %135 : vector<8x128xf32>
    %138 = tpu.reciprocal %137 {approx = true} : vector<8x128xf32> -> vector<8x128xf32>
    %139 = vector.extract_strided_slice %125 {offsets = [0, 128], sizes = [8, 128], strides = [1, 1]} : vector<8x384xf32> to vector<8x128xf32>
    %140 = vector.extract_strided_slice %129 {offsets = [0, 128], sizes = [8, 128], strides = [1, 1]} : vector<8x384xf32> to vector<8x128xf32>
    %141 = arith.addf %139, %140 : vector<8x128xf32>
    %cst_49 = arith.constant 0.000000e+00 : f32
    %142 = vector.broadcast %cst_49 : f32 to vector<8x128xf32>
    %143 = arith.subf %142, %141 : vector<8x128xf32>
    %144 = math.exp %143 : vector<8x128xf32>
    %cst_50 = arith.constant 1.000000e+00 : f32
    %145 = vector.broadcast %cst_50 : f32 to vector<8x128xf32>
    %146 = arith.addf %145, %144 : vector<8x128xf32>
    %147 = tpu.reciprocal %146 {approx = true} : vector<8x128xf32> -> vector<8x128xf32>
    %148 = vector.extract_strided_slice %125 {offsets = [0, 256], sizes = [8, 128], strides = [1, 1]} : vector<8x384xf32> to vector<8x128xf32>
    %149 = vector.extract_strided_slice %129 {offsets = [0, 256], sizes = [8, 128], strides = [1, 1]} : vector<8x384xf32> to vector<8x128xf32>
    %150 = arith.mulf %138, %149 : vector<8x128xf32>
    %151 = arith.addf %148, %150 : vector<8x128xf32>
    %152 = math.tanh %151 : vector<8x128xf32>
    %cst_51 = arith.constant 1.000000e+00 : f32
    %153 = vector.broadcast %cst_51 : f32 to vector<8x128xf32>
    %154 = arith.subf %153, %147 : vector<8x128xf32>
    %155 = arith.mulf %154, %152 : vector<8x128xf32>
    %156 = arith.mulf %147, %121 : vector<8x128xf32>
    %157 = arith.addf %155, %156 : vector<8x128xf32>
    %c4_i32 = arith.constant 4 : i32
    %c8_i32_52 = arith.constant 8 : i32
    %158 = arith.muli %c4_i32, %c8_i32_52 : i32
    %159 = tpu.assume_multiple %158, 8 : i32
    %160 = arith.index_cast %159 : i32 to index
    %c0_53 = arith.constant 0 : index
    %161 = vector.load %arg12[%160, %c0_53] : memref<64x384xf32, #tpu.memory_space<vmem>>, vector<8x384xf32>
    %162 = arith.truncf %157 : vector<8x128xf32> to vector<8x128xbf16>
    %c0_54 = arith.constant 0 : index
    %c0_55 = arith.constant 0 : index
    %163 = vector.load %arg4[%c0_54, %c0_55] : memref<128x384xbf16, #tpu.memory_space<vmem>>, vector<128x384xbf16>
    %cst_56 = arith.constant dense<0.000000e+00> : vector<8x384xf32>
    %164 = tpu.matmul %162, %163, %cst_56 {dimension_numbers = #tpu.dot_dimension_numbers<[1], [0], [0], [1], [0, 0, 1, 1], [], []>} : vector<8x128xbf16>, vector<128x384xbf16>, vector<8x384xf32> -> vector<8x384xf32>
    %165 = arith.addf %164, %12 : vector<8x384xf32>
    %166 = vector.extract_strided_slice %161 {offsets = [0, 0], sizes = [8, 128], strides = [1, 1]} : vector<8x384xf32> to vector<8x128xf32>
    %167 = vector.extract_strided_slice %165 {offsets = [0, 0], sizes = [8, 128], strides = [1, 1]} : vector<8x384xf32> to vector<8x128xf32>
    %168 = arith.addf %166, %167 : vector<8x128xf32>
    %cst_57 = arith.constant 0.000000e+00 : f32
    %169 = vector.broadcast %cst_57 : f32 to vector<8x128xf32>
    %170 = arith.subf %169, %168 : vector<8x128xf32>
    %171 = math.exp %170 : vector<8x128xf32>
    %cst_58 = arith.constant 1.000000e+00 : f32
    %172 = vector.broadcast %cst_58 : f32 to vector<8x128xf32>
    %173 = arith.addf %172, %171 : vector<8x128xf32>
    %174 = tpu.reciprocal %173 {approx = true} : vector<8x128xf32> -> vector<8x128xf32>
    %175 = vector.extract_strided_slice %161 {offsets = [0, 128], sizes = [8, 128], strides = [1, 1]} : vector<8x384xf32> to vector<8x128xf32>
    %176 = vector.extract_strided_slice %165 {offsets = [0, 128], sizes = [8, 128], strides = [1, 1]} : vector<8x384xf32> to vector<8x128xf32>
    %177 = arith.addf %175, %176 : vector<8x128xf32>
    %cst_59 = arith.constant 0.000000e+00 : f32
    %178 = vector.broadcast %cst_59 : f32 to vector<8x128xf32>
    %179 = arith.subf %178, %177 : vector<8x128xf32>
    %180 = math.exp %179 : vector<8x128xf32>
    %cst_60 = arith.constant 1.000000e+00 : f32
    %181 = vector.broadcast %cst_60 : f32 to vector<8x128xf32>
    %182 = arith.addf %181, %180 : vector<8x128xf32>
    %183 = tpu.reciprocal %182 {approx = true} : vector<8x128xf32> -> vector<8x128xf32>
    %184 = vector.extract_strided_slice %161 {offsets = [0, 256], sizes = [8, 128], strides = [1, 1]} : vector<8x384xf32> to vector<8x128xf32>
    %185 = vector.extract_strided_slice %165 {offsets = [0, 256], sizes = [8, 128], strides = [1, 1]} : vector<8x384xf32> to vector<8x128xf32>
    %186 = arith.mulf %174, %185 : vector<8x128xf32>
    %187 = arith.addf %184, %186 : vector<8x128xf32>
    %188 = math.tanh %187 : vector<8x128xf32>
    %cst_61 = arith.constant 1.000000e+00 : f32
    %189 = vector.broadcast %cst_61 : f32 to vector<8x128xf32>
    %190 = arith.subf %189, %183 : vector<8x128xf32>
    %191 = arith.mulf %190, %188 : vector<8x128xf32>
    %192 = arith.mulf %183, %157 : vector<8x128xf32>
    %193 = arith.addf %191, %192 : vector<8x128xf32>
    %c5_i32 = arith.constant 5 : i32
    %c8_i32_62 = arith.constant 8 : i32
    %194 = arith.muli %c5_i32, %c8_i32_62 : i32
    %195 = tpu.assume_multiple %194, 8 : i32
    %196 = arith.index_cast %195 : i32 to index
    %c0_63 = arith.constant 0 : index
    %197 = vector.load %arg12[%196, %c0_63] : memref<64x384xf32, #tpu.memory_space<vmem>>, vector<8x384xf32>
    %198 = arith.truncf %193 : vector<8x128xf32> to vector<8x128xbf16>
    %c0_64 = arith.constant 0 : index
    %c0_65 = arith.constant 0 : index
    %199 = vector.load %arg4[%c0_64, %c0_65] : memref<128x384xbf16, #tpu.memory_space<vmem>>, vector<128x384xbf16>
    %cst_66 = arith.constant dense<0.000000e+00> : vector<8x384xf32>
    %200 = tpu.matmul %198, %199, %cst_66 {dimension_numbers = #tpu.dot_dimension_numbers<[1], [0], [0], [1], [0, 0, 1, 1], [], []>} : vector<8x128xbf16>, vector<128x384xbf16>, vector<8x384xf32> -> vector<8x384xf32>
    %201 = arith.addf %200, %12 : vector<8x384xf32>
    %202 = vector.extract_strided_slice %197 {offsets = [0, 0], sizes = [8, 128], strides = [1, 1]} : vector<8x384xf32> to vector<8x128xf32>
    %203 = vector.extract_strided_slice %201 {offsets = [0, 0], sizes = [8, 128], strides = [1, 1]} : vector<8x384xf32> to vector<8x128xf32>
    %204 = arith.addf %202, %203 : vector<8x128xf32>
    %cst_67 = arith.constant 0.000000e+00 : f32
    %205 = vector.broadcast %cst_67 : f32 to vector<8x128xf32>
    %206 = arith.subf %205, %204 : vector<8x128xf32>
    %207 = math.exp %206 : vector<8x128xf32>
    %cst_68 = arith.constant 1.000000e+00 : f32
    %208 = vector.broadcast %cst_68 : f32 to vector<8x128xf32>
    %209 = arith.addf %208, %207 : vector<8x128xf32>
    %210 = tpu.reciprocal %209 {approx = true} : vector<8x128xf32> -> vector<8x128xf32>
    %211 = vector.extract_strided_slice %197 {offsets = [0, 128], sizes = [8, 128], strides = [1, 1]} : vector<8x384xf32> to vector<8x128xf32>
    %212 = vector.extract_strided_slice %201 {offsets = [0, 128], sizes = [8, 128], strides = [1, 1]} : vector<8x384xf32> to vector<8x128xf32>
    %213 = arith.addf %211, %212 : vector<8x128xf32>
    %cst_69 = arith.constant 0.000000e+00 : f32
    %214 = vector.broadcast %cst_69 : f32 to vector<8x128xf32>
    %215 = arith.subf %214, %213 : vector<8x128xf32>
    %216 = math.exp %215 : vector<8x128xf32>
    %cst_70 = arith.constant 1.000000e+00 : f32
    %217 = vector.broadcast %cst_70 : f32 to vector<8x128xf32>
    %218 = arith.addf %217, %216 : vector<8x128xf32>
    %219 = tpu.reciprocal %218 {approx = true} : vector<8x128xf32> -> vector<8x128xf32>
    %220 = vector.extract_strided_slice %197 {offsets = [0, 256], sizes = [8, 128], strides = [1, 1]} : vector<8x384xf32> to vector<8x128xf32>
    %221 = vector.extract_strided_slice %201 {offsets = [0, 256], sizes = [8, 128], strides = [1, 1]} : vector<8x384xf32> to vector<8x128xf32>
    %222 = arith.mulf %210, %221 : vector<8x128xf32>
    %223 = arith.addf %220, %222 : vector<8x128xf32>
    %224 = math.tanh %223 : vector<8x128xf32>
    %cst_71 = arith.constant 1.000000e+00 : f32
    %225 = vector.broadcast %cst_71 : f32 to vector<8x128xf32>
    %226 = arith.subf %225, %219 : vector<8x128xf32>
    %227 = arith.mulf %226, %224 : vector<8x128xf32>
    %228 = arith.mulf %219, %193 : vector<8x128xf32>
    %229 = arith.addf %227, %228 : vector<8x128xf32>
    %c6_i32 = arith.constant 6 : i32
    %c8_i32_72 = arith.constant 8 : i32
    %230 = arith.muli %c6_i32, %c8_i32_72 : i32
    %231 = tpu.assume_multiple %230, 8 : i32
    %232 = arith.index_cast %231 : i32 to index
    %c0_73 = arith.constant 0 : index
    %233 = vector.load %arg12[%232, %c0_73] : memref<64x384xf32, #tpu.memory_space<vmem>>, vector<8x384xf32>
    %234 = arith.truncf %229 : vector<8x128xf32> to vector<8x128xbf16>
    %c0_74 = arith.constant 0 : index
    %c0_75 = arith.constant 0 : index
    %235 = vector.load %arg4[%c0_74, %c0_75] : memref<128x384xbf16, #tpu.memory_space<vmem>>, vector<128x384xbf16>
    %cst_76 = arith.constant dense<0.000000e+00> : vector<8x384xf32>
    %236 = tpu.matmul %234, %235, %cst_76 {dimension_numbers = #tpu.dot_dimension_numbers<[1], [0], [0], [1], [0, 0, 1, 1], [], []>} : vector<8x128xbf16>, vector<128x384xbf16>, vector<8x384xf32> -> vector<8x384xf32>
    %237 = arith.addf %236, %12 : vector<8x384xf32>
    %238 = vector.extract_strided_slice %233 {offsets = [0, 0], sizes = [8, 128], strides = [1, 1]} : vector<8x384xf32> to vector<8x128xf32>
    %239 = vector.extract_strided_slice %237 {offsets = [0, 0], sizes = [8, 128], strides = [1, 1]} : vector<8x384xf32> to vector<8x128xf32>
    %240 = arith.addf %238, %239 : vector<8x128xf32>
    %cst_77 = arith.constant 0.000000e+00 : f32
    %241 = vector.broadcast %cst_77 : f32 to vector<8x128xf32>
    %242 = arith.subf %241, %240 : vector<8x128xf32>
    %243 = math.exp %242 : vector<8x128xf32>
    %cst_78 = arith.constant 1.000000e+00 : f32
    %244 = vector.broadcast %cst_78 : f32 to vector<8x128xf32>
    %245 = arith.addf %244, %243 : vector<8x128xf32>
    %246 = tpu.reciprocal %245 {approx = true} : vector<8x128xf32> -> vector<8x128xf32>
    %247 = vector.extract_strided_slice %233 {offsets = [0, 128], sizes = [8, 128], strides = [1, 1]} : vector<8x384xf32> to vector<8x128xf32>
    %248 = vector.extract_strided_slice %237 {offsets = [0, 128], sizes = [8, 128], strides = [1, 1]} : vector<8x384xf32> to vector<8x128xf32>
    %249 = arith.addf %247, %248 : vector<8x128xf32>
    %cst_79 = arith.constant 0.000000e+00 : f32
    %250 = vector.broadcast %cst_79 : f32 to vector<8x128xf32>
    %251 = arith.subf %250, %249 : vector<8x128xf32>
    %252 = math.exp %251 : vector<8x128xf32>
    %cst_80 = arith.constant 1.000000e+00 : f32
    %253 = vector.broadcast %cst_80 : f32 to vector<8x128xf32>
    %254 = arith.addf %253, %252 : vector<8x128xf32>
    %255 = tpu.reciprocal %254 {approx = true} : vector<8x128xf32> -> vector<8x128xf32>
    %256 = vector.extract_strided_slice %233 {offsets = [0, 256], sizes = [8, 128], strides = [1, 1]} : vector<8x384xf32> to vector<8x128xf32>
    %257 = vector.extract_strided_slice %237 {offsets = [0, 256], sizes = [8, 128], strides = [1, 1]} : vector<8x384xf32> to vector<8x128xf32>
    %258 = arith.mulf %246, %257 : vector<8x128xf32>
    %259 = arith.addf %256, %258 : vector<8x128xf32>
    %260 = math.tanh %259 : vector<8x128xf32>
    %cst_81 = arith.constant 1.000000e+00 : f32
    %261 = vector.broadcast %cst_81 : f32 to vector<8x128xf32>
    %262 = arith.subf %261, %255 : vector<8x128xf32>
    %263 = arith.mulf %262, %260 : vector<8x128xf32>
    %264 = arith.mulf %255, %229 : vector<8x128xf32>
    %265 = arith.addf %263, %264 : vector<8x128xf32>
    %c7_i32 = arith.constant 7 : i32
    %c8_i32_82 = arith.constant 8 : i32
    %266 = arith.muli %c7_i32, %c8_i32_82 : i32
    %267 = tpu.assume_multiple %266, 8 : i32
    %268 = arith.index_cast %267 : i32 to index
    %c0_83 = arith.constant 0 : index
    %269 = vector.load %arg12[%268, %c0_83] : memref<64x384xf32, #tpu.memory_space<vmem>>, vector<8x384xf32>
    %270 = arith.truncf %265 : vector<8x128xf32> to vector<8x128xbf16>
    %c0_84 = arith.constant 0 : index
    %c0_85 = arith.constant 0 : index
    %271 = vector.load %arg4[%c0_84, %c0_85] : memref<128x384xbf16, #tpu.memory_space<vmem>>, vector<128x384xbf16>
    %cst_86 = arith.constant dense<0.000000e+00> : vector<8x384xf32>
    %272 = tpu.matmul %270, %271, %cst_86 {dimension_numbers = #tpu.dot_dimension_numbers<[1], [0], [0], [1], [0, 0, 1, 1], [], []>} : vector<8x128xbf16>, vector<128x384xbf16>, vector<8x384xf32> -> vector<8x384xf32>
    %273 = arith.addf %272, %12 : vector<8x384xf32>
    %274 = vector.extract_strided_slice %269 {offsets = [0, 0], sizes = [8, 128], strides = [1, 1]} : vector<8x384xf32> to vector<8x128xf32>
    %275 = vector.extract_strided_slice %273 {offsets = [0, 0], sizes = [8, 128], strides = [1, 1]} : vector<8x384xf32> to vector<8x128xf32>
    %276 = arith.addf %274, %275 : vector<8x128xf32>
    %cst_87 = arith.constant 0.000000e+00 : f32
    %277 = vector.broadcast %cst_87 : f32 to vector<8x128xf32>
    %278 = arith.subf %277, %276 : vector<8x128xf32>
    %279 = math.exp %278 : vector<8x128xf32>
    %cst_88 = arith.constant 1.000000e+00 : f32
    %280 = vector.broadcast %cst_88 : f32 to vector<8x128xf32>
    %281 = arith.addf %280, %279 : vector<8x128xf32>
    %282 = tpu.reciprocal %281 {approx = true} : vector<8x128xf32> -> vector<8x128xf32>
    %283 = vector.extract_strided_slice %269 {offsets = [0, 128], sizes = [8, 128], strides = [1, 1]} : vector<8x384xf32> to vector<8x128xf32>
    %284 = vector.extract_strided_slice %273 {offsets = [0, 128], sizes = [8, 128], strides = [1, 1]} : vector<8x384xf32> to vector<8x128xf32>
    %285 = arith.addf %283, %284 : vector<8x128xf32>
    %cst_89 = arith.constant 0.000000e+00 : f32
    %286 = vector.broadcast %cst_89 : f32 to vector<8x128xf32>
    %287 = arith.subf %286, %285 : vector<8x128xf32>
    %288 = math.exp %287 : vector<8x128xf32>
    %cst_90 = arith.constant 1.000000e+00 : f32
    %289 = vector.broadcast %cst_90 : f32 to vector<8x128xf32>
    %290 = arith.addf %289, %288 : vector<8x128xf32>
    %291 = tpu.reciprocal %290 {approx = true} : vector<8x128xf32> -> vector<8x128xf32>
    %292 = vector.extract_strided_slice %269 {offsets = [0, 256], sizes = [8, 128], strides = [1, 1]} : vector<8x384xf32> to vector<8x128xf32>
    %293 = vector.extract_strided_slice %273 {offsets = [0, 256], sizes = [8, 128], strides = [1, 1]} : vector<8x384xf32> to vector<8x128xf32>
    %294 = arith.mulf %282, %293 : vector<8x128xf32>
    %295 = arith.addf %292, %294 : vector<8x128xf32>
    %296 = math.tanh %295 : vector<8x128xf32>
    %cst_91 = arith.constant 1.000000e+00 : f32
    %297 = vector.broadcast %cst_91 : f32 to vector<8x128xf32>
    %298 = arith.subf %297, %291 : vector<8x128xf32>
    %299 = arith.mulf %298, %296 : vector<8x128xf32>
    %300 = arith.mulf %291, %265 : vector<8x128xf32>
    %301 = arith.addf %299, %300 : vector<8x128xf32>
    %c8_i32_92 = arith.constant 8 : i32
    %c0_93 = arith.constant 0 : index
    %c0_94 = arith.constant 0 : index
    %302 = vector.load %arg11[%c0_93, %c0_94] : memref<8x128xf32, #tpu.memory_space<vmem>>, vector<8x128xf32>
    tpu.vector_store %arg11[%c0_93, %c0_94], %301 {strides = array<i32>} : memref<8x128xf32, #tpu.memory_space<vmem>>, vector<8x128xf32>,
    %c0_i32_95 = arith.constant 0 : i32
    %303 = arith.cmpi eq, %arg0, %c0_i32_95 : i32
    %304 = arith.extui %303 : i1 to i32
    %c0_i32_96 = arith.constant 0 : i32
    %305 = arith.cmpi ne, %304, %c0_i32_96 : i32
    scf.if %305 {
      %c0_97 = arith.constant 0 : index
      %c0_98 = arith.constant 0 : index
      %306 = vector.load %arg11[%c0_97, %c0_98] : memref<8x128xf32, #tpu.memory_space<vmem>>, vector<8x128xf32>
      %cst_99 = arith.constant 0.000000e+00 : f32
      %307 = vector.broadcast %cst_99 : f32 to vector<8x128xf32>
      %308 = arith.maximumf %306, %307 : vector<8x128xf32>
      %309 = arith.truncf %308 : vector<8x128xf32> to vector<8x128xbf16>
      %c0_100 = arith.constant 0 : index
      %c0_101 = arith.constant 0 : index
      %310 = vector.load %arg7[%c0_100, %c0_101] : memref<128x128xbf16, #tpu.memory_space<vmem>>, vector<128x128xbf16>
      %cst_102 = arith.constant dense<0.000000e+00> : vector<8x128xf32>
      %311 = tpu.matmul %309, %310, %cst_102 {dimension_numbers = #tpu.dot_dimension_numbers<[1], [0], [0], [1], [0, 0, 1, 1], [], []>} : vector<8x128xbf16>, vector<128x128xbf16>, vector<8x128xf32> -> vector<8x128xf32>
      %c0_103 = arith.constant 0 : index
      %c0_104 = arith.constant 0 : index
      %312 = vector.load %arg8[%c0_103, %c0_104] : memref<1x128xf32, #tpu.memory_space<vmem>>, vector<1x128xf32>
      %313 = vector.broadcast %312 : vector<1x128xf32> to vector<8x128xf32>
      %314 = arith.addf %311, %313 : vector<8x128xf32>
      %c0_105 = arith.constant 0 : index
      %c0_106 = arith.constant 0 : index
      %315 = vector.load %arg9[%c0_105, %c0_106] : memref<8x128xf32, #tpu.memory_space<vmem>>, vector<8x128xf32>
      tpu.vector_store %arg9[%c0_105, %c0_106], %314 {strides = array<i32>} : memref<8x128xf32, #tpu.memory_space<vmem>>, vector<8x128xf32>,
      %c0_107 = arith.constant 0 : index
      %c0_108 = arith.constant 0 : index
      %316 = vector.load %arg10[%c0_107, %c0_108] : memref<8x128xf32, #tpu.memory_space<vmem>>, vector<8x128xf32>
      tpu.vector_store %arg10[%c0_107, %c0_108], %306 {strides = array<i32>} : memref<8x128xf32, #tpu.memory_space<vmem>>, vector<8x128xf32>,
    } else {
    }
    return
  }
  func.func @transform_0(%arg0: i32) -> (i32, i32) {
    %c0_i32 = arith.constant 0 : i32
    %c0_i32_0 = arith.constant 0 : i32
    return %arg0, %c0_i32 : i32, i32
  }
  func.func @transform_1(%arg0: i32) -> (i32, i32) {
    %c0_i32 = arith.constant 0 : i32
    %c0_i32_0 = arith.constant 0 : i32
    %c0_i32_1 = arith.constant 0 : i32
    return %c0_i32, %c0_i32_0 : i32, i32
  }
  func.func @transform_2(%arg0: i32) -> (i32, i32) {
    %c0_i32 = arith.constant 0 : i32
    %c0_i32_0 = arith.constant 0 : i32
    %c0_i32_1 = arith.constant 0 : i32
    return %c0_i32, %c0_i32_0 : i32, i32
  }
  func.func @transform_3(%arg0: i32) -> (i32, i32) {
    %c0_i32 = arith.constant 0 : i32
    %c0_i32_0 = arith.constant 0 : i32
    %c0_i32_1 = arith.constant 0 : i32
    return %c0_i32, %c0_i32_0 : i32, i32
  }
  func.func @transform_4(%arg0: i32) -> (i32, i32) {
    %c0_i32 = arith.constant 0 : i32
    %c0_i32_0 = arith.constant 0 : i32
    %c0_i32_1 = arith.constant 0 : i32
    return %c0_i32, %c0_i32_0 : i32, i32
  }
  func.func @transform_5(%arg0: i32) -> (i32, i32) {
    %c0_i32 = arith.constant 0 : i32
    %c0_i32_0 = arith.constant 0 : i32
    %c0_i32_1 = arith.constant 0 : i32
    return %c0_i32, %c0_i32_0 : i32, i32
  }
  func.func @transform_6(%arg0: i32) -> (i32, i32) {
    %c0_i32 = arith.constant 0 : i32
    %c0_i32_0 = arith.constant 0 : i32
    %c0_i32_1 = arith.constant 0 : i32
    return %c0_i32, %c0_i32_0 : i32, i32
  }
  func.func @transform_7(%arg0: i32) -> (i32, i32) {
    %c0_i32 = arith.constant 0 : i32
    %c0_i32_0 = arith.constant 0 : i32
    %c0_i32_1 = arith.constant 0 : i32
    return %c0_i32, %c0_i32_0 : i32, i32
  }
  func.func @transform_8(%arg0: i32) -> (i32, i32) {
    %c0_i32 = arith.constant 0 : i32
    %c0_i32_0 = arith.constant 0 : i32
    %c0_i32_1 = arith.constant 0 : i32
    return %c0_i32, %c0_i32_0 : i32, i32
  }
  func.func @transform_9(%arg0: i32) -> (i32, i32) {
    %c0_i32 = arith.constant 0 : i32
    %c0_i32_0 = arith.constant 0 : i32
    %c0_i32_1 = arith.constant 0 : i32
    return %c0_i32, %c0_i32_0 : i32, i32
  }
}

</mosaic_0001>

<bundles_post_ra>
// kernel: _gru_estimator_forward.1
= control target key start
LH: loop header
LB: loop body
LE: loop exit
PB: predicated region body
PF: predicated region fallthrough
CT: control target
= control target key end

     0   :  { %15 = vsyncpa [#allocation5], 0  ;;  %s1968_s30 = smov [#allocation4]   ;;  %s2605_s0 = inlined_call_operand.vmem [shape: bf16[64,16], index: 0, kind: input, shape index: {}]   ;;  %s2606_s1 = inlined_call_operand.vmem [shape: f32[8,128], index: 1, kind: input, shape index: {}]   ;;  %s2607_s2 = inlined_call_operand.vmem [shape: bf16[16,384], index: 2, kind: input, shape index: {}]   ;;  %s2608_s3 = inlined_call_operand.hbm [shape: bf16[128,384], index: 3, kind: input, shape index: {}]   ;;  %s2609_s4 = inlined_call_operand.vmem [shape: f32[1,384], index: 4, kind: input, shape index: {}]   ;;  %s2610_s5 = inlined_call_operand.vmem [shape: f32[1,384], index: 5, kind: input, shape index: {}]   ;;  %s2611_s6 = inlined_call_operand.vmem [shape: bf16[128,128], index: 6, kind: input, shape index: {}]   ;;  %s2612_s7 = inlined_call_operand.vmem [shape: f32[1,128], index: 7, kind: input, shape index: {}]   ;;  %s2613_s8 = inlined_call_operand.vmem [shape: f32[8,128], index: 8, kind: output, shape index: {0}]   ;;  %s2614_s9 = inlined_call_operand.vmem [shape: f32[8,128], index: 9, kind: output, shape index: {1}]  }
   0x1   :  { %s27_s10 = sshll.u32 %s1968_s30, 4  ;;  %s1944_s13 = scalar_lea.hbm %s2608_s3, 3072  ;;  %s28_s10 = int_to_ptr.vmem [resolvable:$true] %s27_s10 }
   0x2   :  { %p1945_p0 = scmp.ne.s32.totalorder %s2608_s3, %s1944_s13  ;;  %p1948_p1 = scmp.lt.u32.totalorder %s1944_s13, %s2608_s3 }
   0x4   :  { %p1950_p2 = pnand %p1948_p1, %p1945_p0 }
   0x6   :  { %1953 = shalt.err (!%p1950_p2)
}
   0x7   :  { %s1954_s18 = scalar_lea.vmem %s28_s10, 3072  ;;  %p1959_p4 = scmp.lt.s32.totalorder %s28_s10, %s28_s10 }
   0x8   :  { %p1955_p3 = scmp.ne.s32.totalorder %s28_s10, %s1954_s18  ;;  %p1960_p5 = scmp.lt.s32.totalorder %s1954_s18, %s1954_s18 }
   0xa   :  { %p1961_p6 = por %p1960_p5, %p1959_p4 }
   0xc   :  { %p1962_p7 = pnand %p1961_p6, %p1955_p3 }
   0xe   :  { %1965 = shalt.err (!%p1962_p7)
}
   0xf   :  { %s1969_s19 = smov 192   ;;  %s1970_s20 = smov 12  }
  0x10   :  { %33 = dma.hbm_to_vmem [thread:$0]  %s2608_s3, 3072, %s28_s10, [#allocation5], %s1969_s19, %s1969_s19, %s1970_s20  }
  0x11   :  { %1966 = dma.done.wait [#allocation5], 3072  }
  0x12   :  { %1967 = vsyncadd [#allocation5], 4294964224  ;;  %v2615_v0 = vmov 0   ;;  %v1792_v1 = vld [vmem:[%s2607_s2 + $0x4] ss:$12 sps:$4 sm:$0xff]   ;;  %vm117_vm0 = vcmask 130048   ;;  %v66_v35 = vlaneseq }
  0x13   :  { %162 = vmatprep.mubr.bf16.mxu0 %v2615_v0  ;;  %v1794_v2 = vld [vmem:[%s2607_s2] ss:$12 sps:$4 sm:$0xff]   ;;  %130 = vmatprep.subr.bf16.mxu0 %v1792_v1  ;;  %v2046_v4 = vld [vmem:[#allocation4 + $0x4] ss:$12 sps:$4 sm:$0xff]   ;;  %v2050_v6 = vld [vmem:[#allocation4 + $0x1c] ss:$12 sps:$4 sm:$0xff]  }
  0x14   :  { %v1795_v3 = vld [vmem:[%s2605_s0] sm:$0xff]   ;;  %131 = vmatpush1.bf16.msra.mxu0 %v1794_v2  ;;  %v1802_v9 = vld [vmem:[%s2605_s0 + $0x8] sm:$0xff]   ;;  %v2066_v10 = vld [vmem:[#allocation4 + $0x30] ss:$12 sps:$4 sm:$0xff]   ;;  %v2617_v17 = vmov 0.0   ;;  %vm1973_vm1 = vmmov 0  }
  0x15   :  { %v2048_v5 = vld [vmem:[#allocation4] ss:$12 sps:$4 sm:$0xff]   ;;  %1598 = vmatprep.mubr.msk.bf16.mxu1 %vm117_vm0, %v1795_v3  ;;  %477 = vmatprep.subr.bf16.mxu0 %v2046_v4  ;;  %v2056_v7 = vld [vmem:[#allocation4 + $0x18] ss:$12 sps:$4 sm:$0xff]   ;;  %v1817_v12 = vld [vmem:[%s2607_s2 + $0x8] ss:$12 sps:$4 sm:$0xff]  }
  0x16   :  { %v2060_v8 = vld [vmem:[#allocation4 + $0x34] ss:$12 sps:$4 sm:$0xff]   ;;  %v2069_v11 = vld [vmem:[#allocation4 + $0x4c] ss:$12 sps:$4 sm:$0xff]   ;;  %v2080_v14 = vld [vmem:[#allocation4 + $0x64] ss:$12 sps:$4 sm:$0xff]   ;;  %1596 = vmatprep.subr.bf16.mxu1 %v1817_v12 }
  0x17   :  { %1469 = vmatmul.mubr.msk.bf16.vlgmr.msra.gmra.mrb[0].mxu0 %vm117_vm0, %v1795_v3  ;;  %v2076_v13 = vld [vmem:[#allocation4 + $0x48] ss:$12 sps:$4 sm:$0xff]   ;;  %1597 = vmatpush3.bf16.msra.mxu1 %v1817_v12  ;;  %v2089_v18 = vld [vmem:[#allocation4 + $0x60] ss:$12 sps:$4 sm:$0xff]   ;;  %v2102_v21 = vld [vmem:[#allocation4 + $0x78] ss:$12 sps:$4 sm:$0xff]  }
  0x18   :  { %478 = vmatpush1.bf16.msra.mxu0 %v2048_v5  ;;  %172 = vmatprep.mubr.bf16.mxu0 %v2615_v0  ;;  %v2082_v15 = vld [vmem:[#allocation4 + $0x8] ss:$12 sps:$4 sm:$0xff]   ;;  %v2096_v20 = vld [vmem:[#allocation4 + $0x20] ss:$12 sps:$4 sm:$0xff]   ;;  %v1816_v22 = vld [vmem:[%s2605_s0 + $0x18] sm:$0xff]   ;;  %v2196_v36 = vshrl.u32 %v66_v35, 7 }
  0x19   :  { %479 = vmatprep.subr.bf16.mxu0 %v2050_v6  ;;  %v1809_v16 = vld [vmem:[%s2605_s0 + $0x10] sm:$0xff]   ;;  %1606 = vmatprep.subr.bf16.mxu1 %v2617_v17  ;;  %v2092_v19 = vld [vmem:[#allocation4 + $0x7c] ss:$12 sps:$4 sm:$0xff]   ;;  %v2114_v25 = vld [vmem:[#allocation4 + $0x38] ss:$12 sps:$4 sm:$0xff]  }
  0x1a   :  { %1599 = vmatmul.mubr.msk.bf16.vlgmr.msra.gmra.mrb[0].mxu1 %vm117_vm0, %v1802_v9  ;;  %v2109_v23 = vld [vmem:[#allocation4 + $0x94] ss:$12 sps:$4 sm:$0xff]   ;;  %v2111_v24 = vld [vmem:[#allocation4 + $0x90] ss:$12 sps:$4 sm:$0xff]   ;;  %v2116_v26 = vld [vmem:[#allocation4 + $0xac] ss:$12 sps:$4 sm:$0xff]  }
  0x1b   :  { %1607 = vmatpush3.bf16.msra.mxu1 %v2082_v15  ;;  %1602 = vmatprep.mubr.msk.bf16.mxu1 %vm117_vm0, %v1809_v16  ;;  %v2120_v27 = vld [vmem:[#allocation4 + $0x50] ss:$12 sps:$4 sm:$0xff]   ;;  %v2130_v28 = vld [vmem:[#allocation4 + $0xa8] ss:$12 sps:$4 sm:$0xff]   ;;  %v2136_v29 = vld [vmem:[%s2606_s1] sm:$0xff]  ;;  %v68_v37 = vsub.s32 0, %v2196_v36 }
  0x1c   :  { %480 = vmatpush1.bf16.msra.mxu0 %v2056_v7  ;;  %1608 = vmatprep.subr.bf16.mxu1 %v2617_v17  ;;  %v2140_v30 = vld [vmem:[#allocation4 + $0x68] ss:$12 sps:$4 sm:$0xff]   ;;  %v316_v31 = vpack.c.bf16 %v2136_v29, %v2136_v29  ;;  %v2148_v32 = vld [vmem:[#allocation4 + $0x80] ss:$12 sps:$4 sm:$0xff]   ;;  %v2155_v33 = vld [vmem:[#allocation4 + $0x98] ss:$12 sps:$4 sm:$0xff]  }
  0x1d   :  { %481 = vmatprep.subr.bf16.mxu0 %v2060_v8  ;;  %v2161_v34 = vld [vmem:[#allocation4 + $0xb0] ss:$12 sps:$4 sm:$0xff]   ;;  %v64_v38 = vld [vmem:[%s2609_s4] sm:$0x7]  ;;  %v72_v39 = vsub.s32 1, %v2196_v36  ;;  %v2619_v48 = vsub.s32 2, %v2196_v36 }
  0x1e   :  { %v69_v41 = vrot.slane %v64_v38, %v68_v37 }
  0x1f   :  { %1470 = vmatmul.mubr.msk.bf16.gmra.mrb[4].mxu0 %vm117_vm0, %v1802_v9  ;;  %1609 = vmatpush3.bf16.msra.mxu1 %v2096_v20  ;;  %v73_v43 = vrot.slane %v64_v38, %v72_v39  ;;  %v2216_v56 = vrot.slane %v64_v38, %v2619_v48 }
  0x20   :  { %482 = vmatpush1.bf16.msra.mxu0 %v2066_v10  ;;  %182 = vmatprep.mubr.bf16.mxu0 %v2615_v0 }
  0x21   :  { %483 = vmatprep.subr.bf16.mxu0 %v2069_v11  ;;  %1610 = vmatprep.subr.bf16.mxu1 %v2617_v17 }
  0x22   :  { %1603 = vmatmul.mubr.msk.bf16.gmra.mrb[4].mxu1 %vm117_vm0, %v1816_v22 }
  0x23   :  { %1611 = vmatpush3.bf16.msra.mxu1 %v2114_v25  ;;  %1622 = vmatprep.mubr.msk.bf16.mxu1 %vm1973_vm1, %v2617_v17 }
  0x24   :  { %484 = vmatpush1.bf16.msra.mxu0 %v2076_v13  ;;  %1612 = vmatprep.subr.bf16.mxu1 %v2617_v17 }
  0x25   :  { %485 = vmatprep.subr.bf16.mxu0 %v2080_v14 }
  0x27   :  { %1471 = vmatmul.mubr.msk.bf16.gmra.mrb[8].mxu0 %vm117_vm0, %v1809_v16  ;;  %1613 = vmatpush3.bf16.msra.mxu1 %v2120_v27 }
  0x28   :  { %486 = vmatpush1.bf16.msra.mxu0 %v2089_v18  ;;  %192 = vmatprep.mubr.bf16.mxu0 %v2615_v0 }
  0x29   :  { %487 = vmatprep.subr.bf16.mxu0 %v2092_v19  ;;  %1614 = vmatprep.subr.bf16.mxu1 %v2617_v17 }
  0x2b   :  { %1615 = vmatpush3.bf16.msra.mxu1 %v2140_v30 }
  0x2c   :  { %488 = vmatpush1.bf16.msra.mxu0 %v2102_v21  ;;  %1616 = vmatprep.subr.bf16.mxu1 %v2617_v17 }
  0x2d   :  { %489 = vmatprep.subr.bf16.mxu0 %v2109_v23 }
  0x2f   :  { %1472 = vmatmul.mubr.msk.bf16.gmra.mrb[12].mxu0 %vm117_vm0, %v1816_v22  ;;  %1617 = vmatpush3.bf16.msra.mxu1 %v2148_v32 }
  0x30   :  { %490 = vmatpush1.bf16.msra.mxu0 %v2111_v24  ;;  %509 = vmatprep.mubr.bf16.mxu0 %v2615_v0 }
  0x31   :  { %491 = vmatprep.subr.bf16.mxu0 %v2116_v26  ;;  %1618 = vmatprep.subr.bf16.mxu1 %v2617_v17 }
  0x33   :  { %1619 = vmatpush3.bf16.msra.mxu1 %v2155_v33 }
  0x34   :  { %492 = vmatpush1.bf16.msra.mxu0 %v2130_v28  ;;  %1620 = vmatprep.subr.bf16.mxu1 %v2617_v17 }
  0x35   :  { %584 = vmatprep.subr.bf16.mxu0 %v2046_v4 }
  0x37   :  { %510 = vmatmul.mubr.bf16.vlgmr.msra.gmra.mrb[16].mxu0 %v316_v31  ;;  %1621 = vmatpush3.bf16.msra.mxu1 %v2161_v34 }
  0x38   :  { %585 = vmatpush1.bf16.msra.mxu0 %v2048_v5  ;;  %616 = vmatprep.mubr.bf16.mxu0 %v2615_v0 }
  0x39   :  { %586 = vmatprep.subr.bf16.mxu0 %v2050_v6  ;;  %1626 = vmatprep.subr.bf16.mxu1 %v2617_v17 }
  0x3a   :  { %1623 = vmatmul.mubr.bf16.vlgmr.msra.gmra.mrb[8].mxu1 %v316_v31 }
  0x3b   :  { %1627 = vmatpush3.bf16.msra.mxu1 %v2082_v15  ;;  %1642 = vmatprep.mubr.msk.bf16.mxu1 %vm1973_vm1, %v2617_v17 }
  0x3c   :  { %587 = vmatpush1.bf16.msra.mxu0 %v2056_v7  ;;  %1628 = vmatprep.subr.bf16.mxu1 %v2617_v17 }
  0x3d   :  { %588 = vmatprep.subr.bf16.mxu0 %v2060_v8 }
  0x3f   :  { %1629 = vmatpush3.bf16.msra.mxu1 %v2096_v20 }
  0x40   :  { %589 = vmatpush1.bf16.msra.mxu0 %v2066_v10  ;;  %1630 = vmatprep.subr.bf16.mxu1 %v2617_v17 }
  0x41   :  { %590 = vmatprep.subr.bf16.mxu0 %v2069_v11 }
  0x43   :  { %1631 = vmatpush3.bf16.msra.mxu1 %v2114_v25 }
  0x44   :  { %591 = vmatpush1.bf16.msra.mxu0 %v2076_v13  ;;  %1632 = vmatprep.subr.bf16.mxu1 %v2617_v17 }
  0x45   :  { %592 = vmatprep.subr.bf16.mxu0 %v2080_v14 }
  0x47   :  { %1633 = vmatpush3.bf16.msra.mxu1 %v2120_v27 }
  0x48   :  { %593 = vmatpush1.bf16.msra.mxu0 %v2089_v18  ;;  %1634 = vmatprep.subr.bf16.mxu1 %v2617_v17 }
  0x49   :  { %594 = vmatprep.subr.bf16.mxu0 %v2092_v19 }
  0x4b   :  { %1635 = vmatpush3.bf16.msra.mxu1 %v2140_v30 }
  0x4c   :  { %595 = vmatpush1.bf16.msra.mxu0 %v2102_v21  ;;  %1636 = vmatprep.subr.bf16.mxu1 %v2617_v17 }
  0x4d   :  { %596 = vmatprep.subr.bf16.mxu0 %v2109_v23 }
  0x4f   :  { %1637 = vmatpush3.bf16.msra.mxu1 %v2148_v32 }
  0x50   :  { %597 = vmatpush1.bf16.msra.mxu0 %v2111_v24  ;;  %1638 = vmatprep.subr.bf16.mxu1 %v2617_v17 }
  0x51   :  { %598 = vmatprep.subr.bf16.mxu0 %v2116_v26 }
  0x53   :  { %1639 = vmatpush3.bf16.msra.mxu1 %v2155_v33 }
  0x54   :  { %599 = vmatpush1.bf16.msra.mxu0 %v2130_v28  ;;  %1640 = vmatprep.subr.bf16.mxu1 %v2617_v17 }
  0x55   :  { %691 = vmatprep.subr.bf16.mxu0 %v2046_v4 }
  0x57   :  { %1641 = vmatpush3.bf16.msra.mxu1 %v2161_v34 }
  0x58   :  { %1646 = vmatprep.subr.bf16.mxu1 %v2617_v17 }
  0xea   :  { %v164_v40 = vpop.f32.mrb[0].mxu0 }
  0xeb   :  { %v166_v42 = vpop.f32.mrb[1].mxu0 }
  0xec   :  { %v168_v44 = vpop.f32.mrb[2].mxu0 }
  0xed   :  { %v2203_v45 = vadd.f32 %v168_v44, %v69_v41  ;;  %v170_v46 = vpop.f32.mrb[3].mxu0  ;;  %v1600_v58 = vpop.f32.mrb[0].mxu1 }
  0xee   :  { %v2205_v47 = vadd.f32 %v170_v46, %v73_v43  ;;  %v2221_v59 = vadd.f32 %v1600_v58, %v2216_v56  ;;  %v237_v60 = vpop.f32.mrb[1].mxu1 }
  0xef   :  { %v1601_v62 = vpop.f32.mrb[2].mxu1 }
  0xf0   :  { %v2226_v2 = vadd.f32 %v1601_v62, %v2216_v56  ;;  %v240_v3 = vpop.f32.mrb[3].mxu1 }
  0xf1   :  { %v2231_v16 = vadd.f32 %v240_v3, %v2216_v56 }
  0xf2   :  { %v174_v49 = vpop.f32.mrb[4].mxu0 }
  0xf3   :  { %v2208_v50 = vadd.f32 %v174_v49, %v69_v41  ;;  %v176_v51 = vpop.f32.mrb[5].mxu0 }
  0xf4   :  { %v2210_v52 = vadd.f32 %v176_v51, %v73_v43  ;;  %v178_v53 = vpop.f32.mrb[6].mxu0 }
  0xf5   :  { %v2212_v54 = vadd.f32 %v178_v53, %v69_v41  ;;  %v180_v55 = vpop.f32.mrb[7].mxu0  ;;  %v1604_v38 = vpop.f32.mrb[4].mxu1 }
  0xf6   :  { %v2218_v57 = vadd.f32 %v180_v55, %v73_v43  ;;  %v2238_v44 = vadd.f32 %v1604_v38, %v2216_v56  ;;  %v253_v46 = vpop.f32.mrb[5].mxu1 }
  0xf7   :  { %v2241_v51 = vadd.f32 %v253_v46, %v2216_v56  ;;  %v1605_v53 = vpop.f32.mrb[6].mxu1 }
  0xf8   :  { %2622 = vst [vmem:[#allocation9_spill] sm:$0xff] %v2238_v44  ;;  %v256_v62 = vpop.f32.mrb[7].mxu1  ;;  %v167_v44 = vadd.f32 %v166_v42, %v73_v43  ;;  %v2629_v42 = vsub.s32 2, %v2196_v36 }
  0xfa   :  { %v184_v61 = vpop.f32.mrb[8].mxu0 }
  0xfb   :  { %v2223_v63 = vadd.f32 %v184_v61, %v69_v41  ;;  %v186_v1 = vpop.f32.mrb[9].mxu0  ;;  %v2246_v61 = vadd.f32 %v1605_v53, %v2216_v56 }
  0xfc   :  { %v2228_v9 = vadd.f32 %v186_v1, %v73_v43  ;;  %v188_v12 = vpop.f32.mrb[10].mxu0 }
  0xfd   :  { %v2233_v22 = vadd.f32 %v188_v12, %v69_v41  ;;  %v190_v31 = vpop.f32.mrb[11].mxu0  ;;  %2624 = vst [vmem:[#allocation11_spill] sm:$0xff] %v2246_v61  ;;  %v292_v12 = vld [vmem:[%s2610_s5] sm:$0x7] }
  0xfe   :  { %v2235_v35 = vadd.f32 %v190_v31, %v73_v43  ;;  %v2254_v31 = vadd.f32 %v256_v62, %v2216_v56  ;;  %v2260_v0 = vrot.slane %v292_v12, %v68_v37  ;;  %v2262_v53 = vrot.slane %v292_v12, %v72_v39 }
  0xff   :  { %2620 = vst [vmem:[#allocation7_spill] sm:$0xff] %v2233_v22 }
 0x100   :  { %2621 = vst [vmem:[#allocation8_spill] sm:$0xff] %v2235_v35  ;;  %2626 = vst [vmem:[#allocation13_spill] sm:$0xff] %v2254_v31 }
 0x102   :  { %v194_v49 = vpop.f32.mrb[12].mxu0 }
 0x103   :  { %v2243_v55 = vadd.f32 %v194_v49, %v69_v41  ;;  %v196_v58 = vpop.f32.mrb[13].mxu0 }
 0x104   :  { %v2248_v1 = vadd.f32 %v196_v58, %v73_v43  ;;  %v198_v3 = vpop.f32.mrb[14].mxu0  ;;  %v165_v58 = vadd.f32 %v164_v40, %v69_v41 }
 0x105   :  { %2623 = vst [vmem:[#allocation10_spill] sm:$0xff] %v2243_v55  ;;  %v2256_v38 = vadd.f32 %v198_v3, %v69_v41  ;;  %v200_v46 = vpop.f32.mrb[15].mxu0 }
 0x106   :  { %2625 = vst [vmem:[#allocation12_spill] sm:$0xff] %v2248_v1  ;;  %v2258_v49 = vadd.f32 %v200_v46, %v73_v43  ;;  %v2268_v43 = vrot.slane %v292_v12, %v2629_v42 }
 0x107   :  { %2627 = vst [vmem:[#allocation14_spill] sm:$0xff] %v2256_v38 }
 0x108   :  { %2628 = vst [vmem:[#allocation15_spill] sm:$0xff] %v2258_v49 }
 0x10a   :  { %v511_v17 = vpop.f32.mrb[16].mxu0 }
 0x10b   :  { %v512_v48 = vadd.f32 %v511_v17, %v2260_v0  ;;  %v513_v61 = vpop.f32.mrb[17].mxu0 }
 0x10c   :  { %v514_v1 = vadd.f32 %v513_v61, %v2262_v53  ;;  %v515_v55 = vpop.f32.mrb[18].mxu0 }
 0x10d   :  { %v558_v62 = vadd.f32 %v512_v48, %v165_v58  ;;  %v516_v31 = vpop.f32.mrb[19].mxu0  ;;  %v552_v49 = vpop.f32.mrb[8].mxu1 }
 0x10e   :  { %v564_v3 = vadd.f32 %v514_v1, %v167_v44  ;;  %v1624_v39 = vpop.f32.mrb[9].mxu1  ;;  %v553_v44 = vadd.f32 %v552_v49, %v2268_v43 }
 0x10f   :  { %v559_v38 = vsub.f32 0.0, %v558_v62  ;;  %v555_v22 = vpop.f32.mrb[10].mxu1 }
 0x110   :  { %v565_v46 = vsub.f32 0.0, %v564_v3  ;;  %v1625_v40 = vpop.f32.mrb[11].mxu1 }
 0x111   :  { %v560_v35 = vmul.f32 1.442695, %v559_v38 }
 0x112   :  { %v566_v37 = vmul.f32 1.442695, %v565_v46 }
 0x113   :  { %1840 = vpow2.f32 %v560_v35  ;;  %v238_v35 = vadd.f32 %v237_v60, %v2216_v56  ;;  %v2630_v56 = vmov 0.0   ;;  %v2631_v60 = vmov 0  }
 0x114   :  { %1842 = vpow2.f32 %v566_v37 }
 0x11d   :  { %v1841_v41 = vpop.eup %1840 }
 0x11e   :  { %v562_v17 = vadd.f32 1.0, %v1841_v41  ;;  %v1843_v48 = vpop.eup %1842 }
 0x11f   :  { %v568_v55 = vadd.f32 1.0, %v1843_v48 }
 0x120   :  { %1844 = vrcp.f32 %v562_v17 }
 0x121   :  { %1846 = vrcp.f32 %v568_v55 }
 0x12a   :  { %v1845_v61 = vpop.eup %1844 }
 0x12b   :  { %v570_v1 = vmul.f32 %v1845_v61, %v553_v44  ;;  %v1847_v22 = vpop.eup %1846 }
 0x12c   :  { %v573_v38 = vsub.f32 1.0, %v1847_v22  ;;  %v575_v3 = vmul.f32 %v1847_v22, %v2136_v29 }
 0x12d   :  { %v571_v31 = vadd.f32 %v570_v1, %v238_v35 }
 0x12f   :  { %1848 = vtanh.f32 %v571_v31 }
 0x139   :  { %v1849_v58 = vpop.eup %1848 }
 0x13a   :  { %v574_v62 = vmul.f32 %v1849_v58, %v573_v38 }
 0x13c   :  { %v2273_v36 = vadd.f32 %v575_v3, %v574_v62 }
 0x13e   :  { %v583_v12 = vpack.c.bf16 %v2273_v36, %v2273_v36 }
 0x140   :  { %617 = vmatmul.mubr.bf16.vlgmr.msra.gmra.mrb[20].mxu0 %v583_v12  ;;  %1643 = vmatmul.mubr.bf16.vlgmr.msra.gmra.mrb[12].mxu1 %v583_v12 }
 0x141   :  { %692 = vmatpush1.bf16.msra.mxu0 %v2048_v5  ;;  %1647 = vmatpush3.bf16.msra.mxu1 %v2082_v15 }
 0x142   :  { %693 = vmatprep.subr.bf16.mxu0 %v2050_v6  ;;  %1648 = vmatprep.subr.bf16.mxu1 %v2630_v56 }
 0x143   :  { %723 = vmatprep.mubr.bf16.mxu0 %v2631_v60  ;;  %1662 = vmatprep.mubr.msk.bf16.mxu1 %vm1973_vm1, %v2630_v56 }
 0x145   :  { %694 = vmatpush1.bf16.msra.mxu0 %v2056_v7  ;;  %1649 = vmatpush3.bf16.msra.mxu1 %v2096_v20 }
 0x146   :  { %695 = vmatprep.subr.bf16.mxu0 %v2060_v8  ;;  %1650 = vmatprep.subr.bf16.mxu1 %v2630_v56 }
 0x149   :  { %696 = vmatpush1.bf16.msra.mxu0 %v2066_v10  ;;  %1651 = vmatpush3.bf16.msra.mxu1 %v2114_v25 }
 0x14a   :  { %697 = vmatprep.subr.bf16.mxu0 %v2069_v11  ;;  %1652 = vmatprep.subr.bf16.mxu1 %v2630_v56 }
 0x14d   :  { %698 = vmatpush1.bf16.msra.mxu0 %v2076_v13  ;;  %1653 = vmatpush3.bf16.msra.mxu1 %v2120_v27 }
 0x14e   :  { %699 = vmatprep.subr.bf16.mxu0 %v2080_v14  ;;  %1654 = vmatprep.subr.bf16.mxu1 %v2630_v56 }
 0x151   :  { %700 = vmatpush1.bf16.msra.mxu0 %v2089_v18  ;;  %1655 = vmatpush3.bf16.msra.mxu1 %v2140_v30 }
 0x152   :  { %701 = vmatprep.subr.bf16.mxu0 %v2092_v19  ;;  %1656 = vmatprep.subr.bf16.mxu1 %v2630_v56 }
 0x155   :  { %702 = vmatpush1.bf16.msra.mxu0 %v2102_v21  ;;  %1657 = vmatpush3.bf16.msra.mxu1 %v2148_v32 }
 0x156   :  { %703 = vmatprep.subr.bf16.mxu0 %v2109_v23  ;;  %1658 = vmatprep.subr.bf16.mxu1 %v2630_v56 }
 0x159   :  { %704 = vmatpush1.bf16.msra.mxu0 %v2111_v24  ;;  %1659 = vmatpush3.bf16.msra.mxu1 %v2155_v33 }
 0x15a   :  { %705 = vmatprep.subr.bf16.mxu0 %v2116_v26  ;;  %1660 = vmatprep.subr.bf16.mxu1 %v2630_v56 }
 0x15d   :  { %706 = vmatpush1.bf16.msra.mxu0 %v2130_v28  ;;  %1661 = vmatpush3.bf16.msra.mxu1 %v2161_v34 }
 0x15e   :  { %798 = vmatprep.subr.bf16.mxu0 %v2046_v4  ;;  %1666 = vmatprep.subr.bf16.mxu1 %v2630_v56 }
 0x213   :  { %v618_v29 = vpop.f32.mrb[20].mxu0  ;;  %v659_v49 = vpop.f32.mrb[12].mxu1 }
 0x214   :  { %v619_v46 = vadd.f32 %v618_v29, %v2260_v0  ;;  %v620_v37 = vpop.f32.mrb[21].mxu0  ;;  %v1644_v39 = vpop.f32.mrb[13].mxu1  ;;  %v660_v3 = vadd.f32 %v659_v49, %v2268_v43 }
 0x215   :  { %v621_v40 = vadd.f32 %v620_v37, %v2262_v53  ;;  %v622_v41 = vpop.f32.mrb[22].mxu0  ;;  %v662_v17 = vpop.f32.mrb[14].mxu1 }
 0x216   :  { %v665_v42 = vadd.f32 %v619_v46, %v2203_v45  ;;  %v623_v48 = vpop.f32.mrb[23].mxu0  ;;  %v1645_v55 = vpop.f32.mrb[15].mxu1 }
 0x217   :  { %v671_v44 = vadd.f32 %v621_v40, %v2205_v47 }
 0x218   :  { %v666_v61 = vsub.f32 0.0, %v665_v42 }
 0x219   :  { %v672_v1 = vsub.f32 0.0, %v671_v44 }
 0x21a   :  { %v667_v35 = vmul.f32 1.442695, %v666_v61 }
 0x21b   :  { %v673_v31 = vmul.f32 1.442695, %v672_v1 }
 0x21c   :  { %1850 = vpow2.f32 %v667_v35 }
 0x21d   :  { %1852 = vpow2.f32 %v673_v31 }
 0x226   :  { %v1851_v22 = vpop.eup %1850 }
 0x227   :  { %v669_v38 = vadd.f32 1.0, %v1851_v22  ;;  %v1853_v58 = vpop.eup %1852 }
 0x228   :  { %v675_v62 = vadd.f32 1.0, %v1853_v58 }
 0x229   :  { %1854 = vrcp.f32 %v669_v38 }
 0x22a   :  { %1856 = vrcp.f32 %v675_v62 }
 0x233   :  { %v1855_v12 = vpop.eup %1854 }
 0x234   :  { %v677_v29 = vmul.f32 %v1855_v12, %v660_v3  ;;  %v1857_v47 = vpop.eup %1856 }
 0x235   :  { %v680_v46 = vsub.f32 1.0, %v1857_v47  ;;  %v682_v40 = vmul.f32 %v1857_v47, %v2273_v36 }
 0x236   :  { %v678_v45 = vadd.f32 %v677_v29, %v2231_v16 }
 0x238   :  { %1858 = vtanh.f32 %v678_v45 }
 0x242   :  { %v1859_v37 = vpop.eup %1858 }
 0x243   :  { %v681_v39 = vmul.f32 %v1859_v37, %v680_v46 }
 0x245   :  { %v2319_v41 = vadd.f32 %v682_v40, %v681_v39 }
 0x247   :  { %v690_v17 = vpack.c.bf16 %v2319_v41, %v2319_v41 }
 0x249   :  { %724 = vmatmul.mubr.bf16.vlgmr.msra.gmra.mrb[24].mxu0 %v690_v17  ;;  %1663 = vmatmul.mubr.bf16.vlgmr.msra.gmra.mrb[16].mxu1 %v690_v17 }
 0x24a   :  { %799 = vmatpush1.bf16.msra.mxu0 %v2048_v5  ;;  %1667 = vmatpush3.bf16.msra.mxu1 %v2082_v15 }
 0x24b   :  { %800 = vmatprep.subr.bf16.mxu0 %v2050_v6  ;;  %1668 = vmatprep.subr.bf16.mxu1 %v2630_v56 }
 0x24c   :  { %830 = vmatprep.mubr.bf16.mxu0 %v2631_v60  ;;  %1682 = vmatprep.mubr.msk.bf16.mxu1 %vm1973_vm1, %v2630_v56 }
 0x24e   :  { %801 = vmatpush1.bf16.msra.mxu0 %v2056_v7  ;;  %1669 = vmatpush3.bf16.msra.mxu1 %v2096_v20 }
 0x24f   :  { %802 = vmatprep.subr.bf16.mxu0 %v2060_v8  ;;  %1670 = vmatprep.subr.bf16.mxu1 %v2630_v56 }
 0x252   :  { %803 = vmatpush1.bf16.msra.mxu0 %v2066_v10  ;;  %1671 = vmatpush3.bf16.msra.mxu1 %v2114_v25 }
 0x253   :  { %804 = vmatprep.subr.bf16.mxu0 %v2069_v11  ;;  %1672 = vmatprep.subr.bf16.mxu1 %v2630_v56 }
 0x256   :  { %805 = vmatpush1.bf16.msra.mxu0 %v2076_v13  ;;  %1673 = vmatpush3.bf16.msra.mxu1 %v2120_v27 }
 0x257   :  { %806 = vmatprep.subr.bf16.mxu0 %v2080_v14  ;;  %1674 = vmatprep.subr.bf16.mxu1 %v2630_v56 }
 0x25a   :  { %807 = vmatpush1.bf16.msra.mxu0 %v2089_v18  ;;  %1675 = vmatpush3.bf16.msra.mxu1 %v2140_v30 }
 0x25b   :  { %808 = vmatprep.subr.bf16.mxu0 %v2092_v19  ;;  %1676 = vmatprep.subr.bf16.mxu1 %v2630_v56 }
 0x25e   :  { %809 = vmatpush1.bf16.msra.mxu0 %v2102_v21  ;;  %1677 = vmatpush3.bf16.msra.mxu1 %v2148_v32 }
 0x25f   :  { %810 = vmatprep.subr.bf16.mxu0 %v2109_v23  ;;  %1678 = vmatprep.subr.bf16.mxu1 %v2630_v56 }
 0x262   :  { %811 = vmatpush1.bf16.msra.mxu0 %v2111_v24  ;;  %1679 = vmatpush3.bf16.msra.mxu1 %v2155_v33 }
 0x263   :  { %812 = vmatprep.subr.bf16.mxu0 %v2116_v26  ;;  %1680 = vmatprep.subr.bf16.mxu1 %v2630_v56 }
 0x266   :  { %813 = vmatpush1.bf16.msra.mxu0 %v2130_v28  ;;  %1681 = vmatpush3.bf16.msra.mxu1 %v2161_v34 }
 0x267   :  { %905 = vmatprep.subr.bf16.mxu0 %v2046_v4  ;;  %1686 = vmatprep.subr.bf16.mxu1 %v2630_v56 }
 0x31c   :  { %v725_v16 = vpop.f32.mrb[24].mxu0  ;;  %v766_v36 = vpop.f32.mrb[16].mxu1 }
 0x31d   :  { %v726_v49 = vadd.f32 %v725_v16, %v2260_v0  ;;  %v727_v42 = vpop.f32.mrb[25].mxu0  ;;  %v1664_v48 = vpop.f32.mrb[17].mxu1  ;;  %v767_v46 = vadd.f32 %v766_v36, %v2268_v43 }
 0x31e   :  { %v728_v55 = vadd.f32 %v727_v42, %v2262_v53  ;;  %v729_v44 = vpop.f32.mrb[26].mxu0  ;;  %v769_v61 = vpop.f32.mrb[18].mxu1 }
 0x31f   :  { %v772_v35 = vadd.f32 %v726_v49, %v2208_v50  ;;  %v730_v1 = vpop.f32.mrb[27].mxu0  ;;  %v1665_v31 = vpop.f32.mrb[19].mxu1 }
 0x320   :  { %v778_v22 = vadd.f32 %v728_v55, %v2210_v52 }
 0x321   :  { %v773_v38 = vsub.f32 0.0, %v772_v35 }
 0x322   :  { %v779_v62 = vsub.f32 0.0, %v778_v22 }
 0x323   :  { %v774_v58 = vmul.f32 1.442695, %v773_v38 }
 0x324   :  { %v780_v3 = vmul.f32 1.442695, %v779_v62 }
 0x325   :  { %1860 = vpow2.f32 %v774_v58 }
 0x326   :  { %1862 = vpow2.f32 %v780_v3 }
 0x32f   :  { %v1861_v12 = vpop.eup %1860 }
 0x330   :  { %v776_v29 = vadd.f32 1.0, %v1861_v12  ;;  %v1863_v45 = vpop.eup %1862 }
 0x331   :  { %v782_v47 = vadd.f32 1.0, %v1863_v45 }
 0x332   :  { %1864 = vrcp.f32 %v776_v29 }
 0x333   :  { %1866 = vrcp.f32 %v782_v47 }
 0x33c   :  { %v1865_v37 = vpop.eup %1864 }
 0x33d   :  { %v784_v39 = vmul.f32 %v1865_v37, %v767_v46  ;;  %v1867_v52 = vpop.eup %1866 }
 0x33e   :  { %v787_v40 = vsub.f32 1.0, %v1867_v52  ;;  %v789_v49 = vmul.f32 %v1867_v52, %v2319_v41 }
 0x33f   :  { %v785_v50 = vadd.f32 %v784_v39, %v2221_v59 }
 0x341   :  { %1868 = vtanh.f32 %v785_v50 }
 0x34b   :  { %v1869_v17 = vpop.eup %1868 }
 0x34c   :  { %v788_v16 = vmul.f32 %v1869_v17, %v787_v40 }
 0x34e   :  { %v2365_v42 = vadd.f32 %v789_v49, %v788_v16 }
 0x350   :  { %v797_v48 = vpack.c.bf16 %v2365_v42, %v2365_v42 }
 0x352   :  { %831 = vmatmul.mubr.bf16.vlgmr.msra.gmra.mrb[28].mxu0 %v797_v48  ;;  %1683 = vmatmul.mubr.bf16.vlgmr.msra.gmra.mrb[20].mxu1 %v797_v48 }
 0x353   :  { %906 = vmatpush1.bf16.msra.mxu0 %v2048_v5  ;;  %1687 = vmatpush3.bf16.msra.mxu1 %v2082_v15 }
 0x354   :  { %907 = vmatprep.subr.bf16.mxu0 %v2050_v6  ;;  %1688 = vmatprep.subr.bf16.mxu1 %v2630_v56 }
 0x355   :  { %937 = vmatprep.mubr.bf16.mxu0 %v2631_v60  ;;  %1702 = vmatprep.mubr.msk.bf16.mxu1 %vm1973_vm1, %v2630_v56 }
 0x357   :  { %908 = vmatpush1.bf16.msra.mxu0 %v2056_v7  ;;  %1689 = vmatpush3.bf16.msra.mxu1 %v2096_v20 }
 0x358   :  { %909 = vmatprep.subr.bf16.mxu0 %v2060_v8  ;;  %1690 = vmatprep.subr.bf16.mxu1 %v2630_v56 }
 0x35b   :  { %910 = vmatpush1.bf16.msra.mxu0 %v2066_v10  ;;  %1691 = vmatpush3.bf16.msra.mxu1 %v2114_v25 }
 0x35c   :  { %911 = vmatprep.subr.bf16.mxu0 %v2069_v11  ;;  %1692 = vmatprep.subr.bf16.mxu1 %v2630_v56 }
 0x35f   :  { %912 = vmatpush1.bf16.msra.mxu0 %v2076_v13  ;;  %1693 = vmatpush3.bf16.msra.mxu1 %v2120_v27 }
 0x360   :  { %913 = vmatprep.subr.bf16.mxu0 %v2080_v14  ;;  %1694 = vmatprep.subr.bf16.mxu1 %v2630_v56 }
 0x363   :  { %914 = vmatpush1.bf16.msra.mxu0 %v2089_v18  ;;  %1695 = vmatpush3.bf16.msra.mxu1 %v2140_v30 }
 0x364   :  { %915 = vmatprep.subr.bf16.mxu0 %v2092_v19  ;;  %1696 = vmatprep.subr.bf16.mxu1 %v2630_v56 }
 0x367   :  { %916 = vmatpush1.bf16.msra.mxu0 %v2102_v21  ;;  %1697 = vmatpush3.bf16.msra.mxu1 %v2148_v32 }
 0x368   :  { %917 = vmatprep.subr.bf16.mxu0 %v2109_v23  ;;  %1698 = vmatprep.subr.bf16.mxu1 %v2630_v56 }
 0x36b   :  { %918 = vmatpush1.bf16.msra.mxu0 %v2111_v24  ;;  %1699 = vmatpush3.bf16.msra.mxu1 %v2155_v33 }
 0x36c   :  { %919 = vmatprep.subr.bf16.mxu0 %v2116_v26  ;;  %1700 = vmatprep.subr.bf16.mxu1 %v2630_v56 }
 0x36f   :  { %920 = vmatpush1.bf16.msra.mxu0 %v2130_v28  ;;  %1701 = vmatpush3.bf16.msra.mxu1 %v2161_v34 }
 0x370   :  { %1012 = vmatprep.subr.bf16.mxu0 %v2046_v4  ;;  %1706 = vmatprep.subr.bf16.mxu1 %v2630_v56 }
 0x425   :  { %v832_v59 = vpop.f32.mrb[28].mxu0  ;;  %v873_v41 = vpop.f32.mrb[20].mxu1 }
 0x426   :  { %v833_v36 = vadd.f32 %v832_v59, %v2260_v0  ;;  %v834_v55 = vpop.f32.mrb[29].mxu0  ;;  %v1684_v44 = vpop.f32.mrb[21].mxu1  ;;  %v874_v37 = vadd.f32 %v873_v41, %v2268_v43 }
 0x427   :  { %v835_v61 = vadd.f32 %v834_v55, %v2262_v53  ;;  %v836_v35 = vpop.f32.mrb[30].mxu0  ;;  %v876_v1 = vpop.f32.mrb[22].mxu1 }
 0x428   :  { %v879_v31 = vadd.f32 %v833_v36, %v2212_v54  ;;  %v837_v22 = vpop.f32.mrb[31].mxu0  ;;  %v1685_v38 = vpop.f32.mrb[23].mxu1 }
 0x429   :  { %v885_v58 = vadd.f32 %v835_v61, %v2218_v57 }
 0x42a   :  { %v880_v62 = vsub.f32 0.0, %v879_v31 }
 0x42b   :  { %v886_v3 = vsub.f32 0.0, %v885_v58 }
 0x42c   :  { %v881_v4 = vmul.f32 1.442695, %v880_v62 }
 0x42d   :  { %v887_v12 = vmul.f32 1.442695, %v886_v3 }
 0x42e   :  { %1870 = vpow2.f32 %v881_v4 }
 0x42f   :  { %1872 = vpow2.f32 %v887_v12 }
 0x438   :  { %v1871_v29 = vpop.eup %1870 }
 0x439   :  { %v883_v45 = vadd.f32 1.0, %v1871_v29  ;;  %v1873_v47 = vpop.eup %1872 }
 0x43a   :  { %v889_v46 = vadd.f32 1.0, %v1873_v47  ;;  %v2463_v47 = vld [vmem:[#allocation4] ss:$12 sps:$4 sm:$0xff]  }
 0x43b   :  { %1874 = vrcp.f32 %v883_v45 }
 0x43c   :  { %1876 = vrcp.f32 %v889_v46  ;;  %v2474_v46 = vld [vmem:[#allocation4 + $0x18] ss:$12 sps:$4 sm:$0xff]  }
 0x445   :  { %v1875_v39 = vpop.eup %1874 }
 0x446   :  { %v891_v50 = vmul.f32 %v1875_v39, %v874_v37  ;;  %v1877_v57 = vpop.eup %1876  ;;  %v2478_v37 = vld [vmem:[#allocation4 + $0x34] ss:$12 sps:$4 sm:$0xff]   ;;  %v2486_v39 = vld [vmem:[#allocation4 + $0x4c] ss:$12 sps:$4 sm:$0xff]  }
 0x447   :  { %v894_v52 = vsub.f32 1.0, %v1877_v57  ;;  %v896_v16 = vmul.f32 %v1877_v57, %v2365_v42  ;;  %v2632_v57 = vld [vmem:[#allocation7_spill] sm:$0xff] }
 0x448   :  { %v892_v54 = vadd.f32 %v891_v50, %v2226_v2  ;;  %v2490_v50 = vld [vmem:[#allocation4 + $0x48] ss:$12 sps:$4 sm:$0xff]  }
 0x44a   :  { %1878 = vtanh.f32 %v892_v54  ;;  %v2498_v54 = vld [vmem:[#allocation4 + $0x60] ss:$12 sps:$4 sm:$0xff]  }
 0x454   :  { %v1879_v40 = vpop.eup %1878 }
 0x455   :  { %v895_v17 = vmul.f32 %v1879_v40, %v894_v52 }
 0x457   :  { %v2411_v49 = vadd.f32 %v896_v16, %v895_v17  ;;  %v2633_v17 = vld [vmem:[#allocation8_spill] sm:$0xff] }
 0x459   :  { %v904_v48 = vpack.c.bf16 %v2411_v49, %v2411_v49 }
 0x45b   :  { %938 = vmatmul.mubr.bf16.vlgmr.msra.gmra.mrb[32].mxu0 %v904_v48  ;;  %1703 = vmatmul.mubr.bf16.vlgmr.msra.gmra.mrb[24].mxu1 %v904_v48 }
 0x45c   :  { %1013 = vmatpush1.bf16.msra.mxu0 %v2048_v5  ;;  %1707 = vmatpush3.bf16.msra.mxu1 %v2082_v15  ;;  %v2448_v5 = vld [vmem:[#allocation4 + $0x4] ss:$12 sps:$4 sm:$0xff]  }
 0x45d   :  { %1014 = vmatprep.subr.bf16.mxu0 %v2050_v6  ;;  %1708 = vmatprep.subr.bf16.mxu1 %v2630_v56 }
 0x45e   :  { %1044 = vmatprep.mubr.bf16.mxu0 %v2631_v60  ;;  %1722 = vmatprep.mubr.msk.bf16.mxu1 %vm1973_vm1, %v2630_v56 }
 0x460   :  { %1015 = vmatpush1.bf16.msra.mxu0 %v2056_v7  ;;  %1709 = vmatpush3.bf16.msra.mxu1 %v2096_v20 }
 0x461   :  { %1016 = vmatprep.subr.bf16.mxu0 %v2060_v8  ;;  %1710 = vmatprep.subr.bf16.mxu1 %v2630_v56 }
 0x464   :  { %1017 = vmatpush1.bf16.msra.mxu0 %v2066_v10  ;;  %1711 = vmatpush3.bf16.msra.mxu1 %v2114_v25 }
 0x465   :  { %1018 = vmatprep.subr.bf16.mxu0 %v2069_v11  ;;  %1712 = vmatprep.subr.bf16.mxu1 %v2630_v56 }
 0x468   :  { %1019 = vmatpush1.bf16.msra.mxu0 %v2076_v13  ;;  %1713 = vmatpush3.bf16.msra.mxu1 %v2120_v27 }
 0x469   :  { %1020 = vmatprep.subr.bf16.mxu0 %v2080_v14  ;;  %1714 = vmatprep.subr.bf16.mxu1 %v2630_v56 }
 0x46c   :  { %1021 = vmatpush1.bf16.msra.mxu0 %v2089_v18  ;;  %1715 = vmatpush3.bf16.msra.mxu1 %v2140_v30 }
 0x46d   :  { %1022 = vmatprep.subr.bf16.mxu0 %v2092_v19  ;;  %1716 = vmatprep.subr.bf16.mxu1 %v2630_v56 }
 0x470   :  { %1023 = vmatpush1.bf16.msra.mxu0 %v2102_v21  ;;  %1717 = vmatpush3.bf16.msra.mxu1 %v2148_v32 }
 0x471   :  { %1024 = vmatprep.subr.bf16.mxu0 %v2109_v23  ;;  %1718 = vmatprep.subr.bf16.mxu1 %v2630_v56 }
 0x474   :  { %1025 = vmatpush1.bf16.msra.mxu0 %v2111_v24  ;;  %1719 = vmatpush3.bf16.msra.mxu1 %v2155_v33 }
 0x475   :  { %1026 = vmatprep.subr.bf16.mxu0 %v2116_v26  ;;  %1720 = vmatprep.subr.bf16.mxu1 %v2630_v56 }
 0x478   :  { %1027 = vmatpush1.bf16.msra.mxu0 %v2130_v28  ;;  %1721 = vmatpush3.bf16.msra.mxu1 %v2161_v34 }
 0x479   :  { %1119 = vmatprep.subr.bf16.mxu0 %v2448_v5  ;;  %1726 = vmatprep.subr.bf16.mxu1 %v2630_v56 }
 0x52e   :  { %v939_v6 = vpop.f32.mrb[32].mxu0  ;;  %v980_v7 = vpop.f32.mrb[24].mxu1 }
 0x52f   :  { %v940_v8 = vadd.f32 %v939_v6, %v2260_v0  ;;  %v941_v10 = vpop.f32.mrb[33].mxu0  ;;  %v1704_v11 = vpop.f32.mrb[25].mxu1  ;;  %v981_v22 = vadd.f32 %v980_v7, %v2268_v43 }
 0x530   :  { %v942_v13 = vadd.f32 %v941_v10, %v2262_v53  ;;  %v943_v14 = vpop.f32.mrb[34].mxu0  ;;  %v983_v18 = vpop.f32.mrb[26].mxu1 }
 0x531   :  { %v986_v19 = vadd.f32 %v940_v8, %v2223_v63  ;;  %v944_v2 = vpop.f32.mrb[35].mxu0  ;;  %v1705_v42 = vpop.f32.mrb[27].mxu1  ;;  %v2634_v18 = vld [vmem:[#allocation13_spill] sm:$0xff] }
 0x532   :  { %v992_v59 = vadd.f32 %v942_v13, %v2228_v9 }
 0x533   :  { %v987_v41 = vsub.f32 0.0, %v986_v19 }
 0x534   :  { %v993_v55 = vsub.f32 0.0, %v992_v59 }
 0x535   :  { %v988_v36 = vmul.f32 1.442695, %v987_v41 }
 0x536   :  { %v994_v44 = vmul.f32 1.442695, %v993_v55 }
 0x537   :  { %1880 = vpow2.f32 %v988_v36 }
 0x538   :  { %1882 = vpow2.f32 %v994_v44 }
 0x541   :  { %v1881_v61 = vpop.eup %1880 }
 0x542   :  { %v990_v35 = vadd.f32 1.0, %v1881_v61  ;;  %v1883_v1 = vpop.eup %1882  ;;  %v1931_v61 = vld [vmem:[#allocation4 + $0x8] ss:$12 sps:$4 sm:$0xff]  }
 0x543   :  { %v996_v31 = vadd.f32 1.0, %v1883_v1  ;;  %v1933_v1 = vld [vmem:[#allocation4 + $0x38] ss:$12 sps:$4 sm:$0xff]  }
 0x544   :  { %1884 = vrcp.f32 %v990_v35  ;;  %v1932_v35 = vld [vmem:[#allocation4 + $0x20] ss:$12 sps:$4 sm:$0xff]  }
 0x545   :  { %1886 = vrcp.f32 %v996_v31  ;;  %v1935_v31 = vld [vmem:[#allocation4 + $0x68] ss:$12 sps:$4 sm:$0xff]  }
 0x54e   :  { %v1885_v38 = vpop.eup %1884 }
 0x54f   :  { %v998_v58 = vmul.f32 %v1885_v38, %v981_v22  ;;  %v1887_v9 = vpop.eup %1886  ;;  %v1936_v22 = vld [vmem:[#allocation4 + $0x78] ss:$12 sps:$4 sm:$0xff]   ;;  %v1937_v38 = vld [vmem:[#allocation4 + $0x80] ss:$12 sps:$4 sm:$0xff]  }
 0x550   :  { %v1001_v62 = vsub.f32 1.0, %v1887_v9  ;;  %v1003_v12 = vmul.f32 %v1887_v9, %v2411_v49  ;;  %v1940_v9 = vld [vmem:[#allocation4 + $0x98] ss:$12 sps:$4 sm:$0xff]  }
 0x551   :  { %v999_v63 = vadd.f32 %v998_v58, %v2241_v51  ;;  %v2467_v51 = vld [vmem:[#allocation4 + $0x1c] ss:$12 sps:$4 sm:$0xff]   ;;  %v1938_v58 = vld [vmem:[#allocation4 + $0x94] ss:$12 sps:$4 sm:$0xff]  }
 0x553   :  { %1888 = vtanh.f32 %v999_v63  ;;  %v1939_v63 = vld [vmem:[#allocation4 + $0x90] ss:$12 sps:$4 sm:$0xff]  }
 0x55d   :  { %v1889_v4 = vpop.eup %1888 }
 0x55e   :  { %v1002_v3 = vmul.f32 %v1889_v4, %v1001_v62  ;;  %v1941_v62 = vld [vmem:[#allocation4 + $0xac] ss:$12 sps:$4 sm:$0xff]   ;;  %v1942_v4 = vld [vmem:[#allocation4 + $0xa8] ss:$12 sps:$4 sm:$0xff]  }
 0x560   :  { %v2459_v29 = vadd.f32 %v1003_v12, %v1002_v3  ;;  %v1943_v3 = vld [vmem:[#allocation4 + $0xb0] ss:$12 sps:$4 sm:$0xff]  }
 0x562   :  { %v1011_v45 = vpack.c.bf16 %v2459_v29, %v2459_v29 }
 0x564   :  { %1045 = vmatmul.mubr.bf16.vlgmr.msra.gmra.mrb[36].mxu0 %v1011_v45  ;;  %1723 = vmatmul.mubr.bf16.vlgmr.msra.gmra.mrb[28].mxu1 %v1011_v45 }
 0x565   :  { %1120 = vmatpush1.bf16.msra.mxu0 %v2463_v47  ;;  %1727 = vmatpush3.bf16.msra.mxu1 %v2082_v15  ;;  %v2482_v15 = vld [vmem:[#allocation4 + $0x30] ss:$12 sps:$4 sm:$0xff]  }
 0x566   :  { %1121 = vmatprep.subr.bf16.mxu0 %v2467_v51  ;;  %1728 = vmatprep.subr.bf16.mxu1 %v2630_v56 }
 0x567   :  { %1151 = vmatprep.mubr.bf16.mxu0 %v2631_v60  ;;  %1742 = vmatprep.mubr.msk.bf16.mxu1 %vm1973_vm1, %v2630_v56 }
 0x569   :  { %1122 = vmatpush1.bf16.msra.mxu0 %v2474_v46  ;;  %1729 = vmatpush3.bf16.msra.mxu1 %v2096_v20  ;;  %v2494_v20 = vld [vmem:[#allocation4 + $0x64] ss:$12 sps:$4 sm:$0xff]  }
 0x56a   :  { %1123 = vmatprep.subr.bf16.mxu0 %v2478_v37  ;;  %1730 = vmatprep.subr.bf16.mxu1 %v2630_v56 }
 0x56d   :  { %1124 = vmatpush1.bf16.msra.mxu0 %v2482_v15  ;;  %1731 = vmatpush3.bf16.msra.mxu1 %v2114_v25  ;;  %v2502_v25 = vld [vmem:[#allocation4 + $0x7c] ss:$12 sps:$4 sm:$0xff]  }
 0x56e   :  { %1125 = vmatprep.subr.bf16.mxu0 %v2486_v39  ;;  %1732 = vmatprep.subr.bf16.mxu1 %v2630_v56 }
 0x571   :  { %1126 = vmatpush1.bf16.msra.mxu0 %v2490_v50  ;;  %1733 = vmatpush3.bf16.msra.mxu1 %v2120_v27 }
 0x572   :  { %1127 = vmatprep.subr.bf16.mxu0 %v2494_v20  ;;  %1734 = vmatprep.subr.bf16.mxu1 %v2630_v56 }
 0x575   :  { %1128 = vmatpush1.bf16.msra.mxu0 %v2498_v54  ;;  %1735 = vmatpush3.bf16.msra.mxu1 %v2140_v30 }
 0x576   :  { %1129 = vmatprep.subr.bf16.mxu0 %v2502_v25  ;;  %1736 = vmatprep.subr.bf16.mxu1 %v2630_v56 }
 0x579   :  { %1130 = vmatpush1.bf16.msra.mxu0 %v2102_v21  ;;  %1737 = vmatpush3.bf16.msra.mxu1 %v2148_v32 }
 0x57a   :  { %1131 = vmatprep.subr.bf16.mxu0 %v2109_v23  ;;  %1738 = vmatprep.subr.bf16.mxu1 %v2630_v56 }
 0x57d   :  { %1132 = vmatpush1.bf16.msra.mxu0 %v2111_v24  ;;  %1739 = vmatpush3.bf16.msra.mxu1 %v2155_v33 }
 0x57e   :  { %1133 = vmatprep.subr.bf16.mxu0 %v2116_v26  ;;  %1740 = vmatprep.subr.bf16.mxu1 %v2630_v56 }
 0x581   :  { %1134 = vmatpush1.bf16.msra.mxu0 %v2130_v28  ;;  %1741 = vmatpush3.bf16.msra.mxu1 %v2161_v34 }
 0x582   :  { %1226 = vmatprep.subr.bf16.mxu0 %v2448_v5  ;;  %1746 = vmatprep.subr.bf16.mxu1 %v2630_v56 }
 0x637   :  { %v1046_v21 = vpop.f32.mrb[36].mxu0  ;;  %v1087_v23 = vpop.f32.mrb[28].mxu1 }
 0x638   :  { %v1047_v27 = vadd.f32 %v1046_v21, %v2260_v0  ;;  %v1048_v30 = vpop.f32.mrb[37].mxu0  ;;  %v1724_v24 = vpop.f32.mrb[29].mxu1  ;;  %v1088_v11 = vadd.f32 %v1087_v23, %v2268_v43 }
 0x639   :  { %v1049_v32 = vadd.f32 %v1048_v30, %v2262_v53  ;;  %v1050_v33 = vpop.f32.mrb[38].mxu0  ;;  %v1090_v26 = vpop.f32.mrb[30].mxu1 }
 0x63a   :  { %v1093_v52 = vadd.f32 %v1047_v27, %v2632_v57  ;;  %v1051_v40 = vpop.f32.mrb[39].mxu0  ;;  %v1725_v28 = vpop.f32.mrb[31].mxu1 }
 0x63b   :  { %v1099_v34 = vadd.f32 %v1049_v32, %v2633_v17  ;;  %v2637_v17 = vld [vmem:[#allocation9_spill] sm:$0xff] }
 0x63c   :  { %v1094_v16 = vsub.f32 0.0, %v1093_v52 }
 0x63d   :  { %v1100_v48 = vsub.f32 0.0, %v1099_v34 }
 0x63e   :  { %v1095_v49 = vmul.f32 1.442695, %v1094_v16 }
 0x63f   :  { %v1101_v5 = vmul.f32 1.442695, %v1100_v48 }
 0x640   :  { %1890 = vpow2.f32 %v1095_v49 }
 0x641   :  { %1892 = vpow2.f32 %v1101_v5 }
 0x64a   :  { %v1891_v6 = vpop.eup %1890 }
 0x64b   :  { %v1097_v7 = vadd.f32 1.0, %v1891_v6  ;;  %v1893_v8 = vpop.eup %1892 }
 0x64c   :  { %v1103_v10 = vadd.f32 1.0, %v1893_v8 }
 0x64d   :  { %1894 = vrcp.f32 %v1097_v7 }
 0x64e   :  { %1896 = vrcp.f32 %v1103_v10  ;;  %v1832_v10 = vld [vmem:[%s2611_s6] sm:$0xff]  }
 0x657   :  { %v1895_v13 = vpop.eup %1894 }
 0x658   :  { %v1105_v14 = vmul.f32 %v1895_v13, %v1088_v11  ;;  %v1897_v2 = vpop.eup %1896  ;;  %v1833_v11 = vld [vmem:[%s2611_s6 + $0x8] sm:$0xff]   ;;  %v1834_v13 = vld [vmem:[%s2611_s6 + $0x10] sm:$0xff]  }
 0x659   :  { %v1108_v42 = vsub.f32 1.0, %v1897_v2  ;;  %v1110_v36 = vmul.f32 %v1897_v2, %v2459_v29  ;;  %v1838_v2 = vld [vmem:[%s2611_s6 + $0x30] sm:$0xff]  }
 0x65a   :  { %v1106_v19 = vadd.f32 %v1105_v14, %v2634_v18  ;;  %v1835_v14 = vld [vmem:[%s2611_s6 + $0x18] sm:$0xff]   ;;  %v1836_v18 = vld [vmem:[%s2611_s6 + $0x20] sm:$0xff]  }
 0x65c   :  { %1898 = vtanh.f32 %v1106_v19  ;;  %v1837_v19 = vld [vmem:[%s2611_s6 + $0x28] sm:$0xff]  }
 0x666   :  { %v1899_v59 = vpop.eup %1898 }
 0x667   :  { %v1109_v41 = vmul.f32 %v1899_v59, %v1108_v42  ;;  %v1839_v42 = vld [vmem:[%s2611_s6 + $0x38] sm:$0xff]  }
 0x669   :  { %v2525_v55 = vadd.f32 %v1110_v36, %v1109_v41 }
 0x66b   :  { %v1118_v44 = vpack.c.bf16 %v2525_v55, %v2525_v55 }
 0x66d   :  { %1152 = vmatmul.mubr.bf16.vlgmr.msra.gmra.mrb[40].mxu0 %v1118_v44  ;;  %1743 = vmatmul.mubr.bf16.vlgmr.msra.gmra.mrb[32].mxu1 %v1118_v44 }
 0x66e   :  { %1227 = vmatpush1.bf16.msra.mxu0 %v2463_v47  ;;  %1747 = vmatpush3.bf16.msra.mxu1 %v1931_v61 }
 0x66f   :  { %1228 = vmatprep.subr.bf16.mxu0 %v2467_v51  ;;  %1748 = vmatprep.subr.bf16.mxu1 %v2630_v56 }
 0x670   :  { %1258 = vmatprep.mubr.bf16.mxu0 %v2631_v60  ;;  %1762 = vmatprep.mubr.msk.bf16.mxu1 %vm1973_vm1, %v2630_v56  ;;  %v1934_v60 = vld [vmem:[#allocation4 + $0x50] ss:$12 sps:$4 sm:$0xff]  }
 0x672   :  { %1229 = vmatpush1.bf16.msra.mxu0 %v2474_v46  ;;  %1749 = vmatpush3.bf16.msra.mxu1 %v1932_v35 }
 0x673   :  { %1230 = vmatprep.subr.bf16.mxu0 %v2478_v37  ;;  %1750 = vmatprep.subr.bf16.mxu1 %v2630_v56 }
 0x676   :  { %1231 = vmatpush1.bf16.msra.mxu0 %v2482_v15  ;;  %1751 = vmatpush3.bf16.msra.mxu1 %v1933_v1 }
 0x677   :  { %1232 = vmatprep.subr.bf16.mxu0 %v2486_v39  ;;  %1752 = vmatprep.subr.bf16.mxu1 %v2630_v56  ;;  %v2635_v39 = vld [vmem:[#allocation10_spill] sm:$0xff] }
 0x67a   :  { %1233 = vmatpush1.bf16.msra.mxu0 %v2490_v50  ;;  %1753 = vmatpush3.bf16.msra.mxu1 %v1934_v60  ;;  %v2638_v60 = vld [vmem:[#allocation14_spill] sm:$0xff] }
 0x67b   :  { %1234 = vmatprep.subr.bf16.mxu0 %v2494_v20  ;;  %1754 = vmatprep.subr.bf16.mxu1 %v2630_v56 }
 0x67e   :  { %1235 = vmatpush1.bf16.msra.mxu0 %v2498_v54  ;;  %1755 = vmatpush3.bf16.msra.mxu1 %v1935_v31 }
 0x67f   :  { %1236 = vmatprep.subr.bf16.mxu0 %v2502_v25  ;;  %1756 = vmatprep.subr.bf16.mxu1 %v2630_v56  ;;  %v2636_v25 = vld [vmem:[#allocation12_spill] sm:$0xff] }
 0x682   :  { %1237 = vmatpush1.bf16.msra.mxu0 %v1936_v22  ;;  %1757 = vmatpush3.bf16.msra.mxu1 %v1937_v38 }
 0x683   :  { %1238 = vmatprep.subr.bf16.mxu0 %v1938_v58  ;;  %1758 = vmatprep.subr.bf16.mxu1 %v2630_v56  ;;  %v2639_v58 = vld [vmem:[#allocation15_spill] sm:$0xff] }
 0x686   :  { %1239 = vmatpush1.bf16.msra.mxu0 %v1939_v63  ;;  %1759 = vmatpush3.bf16.msra.mxu1 %v1940_v9 }
 0x687   :  { %1240 = vmatprep.subr.bf16.mxu0 %v1941_v62  ;;  %1760 = vmatprep.subr.bf16.mxu1 %v2630_v56 }
 0x68a   :  { %1241 = vmatpush1.bf16.msra.mxu0 %v1942_v4  ;;  %1761 = vmatpush3.bf16.msra.mxu1 %v1943_v3 }
 0x68b   :  { %1766 = vmatprep.subr.bf16.mxu0 %v2630_v56 }
 0x740   :  { %v1153_v12 = vpop.f32.mrb[40].mxu0  ;;  %v1194_v29 = vpop.f32.mrb[32].mxu1 }
 0x741   :  { %v1154_v45 = vadd.f32 %v1153_v12, %v2260_v0  ;;  %v1155_v47 = vpop.f32.mrb[41].mxu0  ;;  %v1744_v51 = vpop.f32.mrb[33].mxu1  ;;  %v1195_v52 = vadd.f32 %v1194_v29, %v2268_v43 }
 0x742   :  { %v1156_v46 = vadd.f32 %v1155_v47, %v2262_v53  ;;  %v1157_v37 = vpop.f32.mrb[42].mxu0  ;;  %v1197_v15 = vpop.f32.mrb[34].mxu1  ;;  %v2640_v51 = vld [vmem:[#allocation11_spill] sm:$0xff] }
 0x743   :  { %v1200_v50 = vadd.f32 %v1154_v45, %v2635_v39  ;;  %v1158_v20 = vpop.f32.mrb[43].mxu0  ;;  %v1745_v54 = vpop.f32.mrb[35].mxu1 }
 0x744   :  { %v1206_v21 = vadd.f32 %v1156_v46, %v2636_v25 }
 0x745   :  { %v1201_v23 = vsub.f32 0.0, %v1200_v50 }
 0x746   :  { %v1207_v30 = vsub.f32 0.0, %v1206_v21 }
 0x747   :  { %v1202_v27 = vmul.f32 1.442695, %v1201_v23 }
 0x748   :  { %v1208_v24 = vmul.f32 1.442695, %v1207_v30 }
 0x749   :  { %1900 = vpow2.f32 %v1202_v27 }
 0x74a   :  { %1902 = vpow2.f32 %v1208_v24 }
 0x753   :  { %v1901_v32 = vpop.eup %1900 }
 0x754   :  { %v1204_v33 = vadd.f32 1.0, %v1901_v32  ;;  %v1903_v26 = vpop.eup %1902 }
 0x755   :  { %v1210_v57 = vadd.f32 1.0, %v1903_v26 }
 0x756   :  { %1904 = vrcp.f32 %v1204_v33 }
 0x757   :  { %1906 = vrcp.f32 %v1210_v57 }
 0x760   :  { %v1905_v40 = vpop.eup %1904 }
 0x761   :  { %v1212_v28 = vmul.f32 %v1905_v40, %v1195_v52  ;;  %v1907_v16 = vpop.eup %1906 }
 0x762   :  { %v1215_v49 = vsub.f32 1.0, %v1907_v16  ;;  %v1217_v6 = vmul.f32 %v1907_v16, %v2525_v55 }
 0x763   :  { %v1213_v34 = vadd.f32 %v1212_v28, %v2637_v17 }
 0x765   :  { %1908 = vtanh.f32 %v1213_v34 }
 0x76f   :  { %v1909_v48 = vpop.eup %1908 }
 0x770   :  { %v1216_v5 = vmul.f32 %v1909_v48, %v1215_v49 }
 0x772   :  { %v1218_v7 = vadd.f32 %v1217_v6, %v1216_v5 }
 0x774   :  { %v1225_v8 = vpack.c.bf16 %v1218_v7, %v1218_v7 }
 0x776   :  { %1259 = vmatmul.mubr.bf16.vlgmr.msra.gmra.mrb[44].mxu0 %v1225_v8  ;;  %1763 = vmatmul.mubr.bf16.vlgmr.msra.gmra.mrb[36].mxu1 %v1225_v8 }
 0x777   :  { %1782 = vmatprep.mubr.msk.bf16.mxu0 %vm1973_vm1, %v2630_v56  ;;  %1767 = vmatpush3.bf16.msra.mxu0 %v1832_v10 }
 0x778   :  { %1768 = vmatprep.subr.bf16.mxu0 %v2630_v56 }
 0x77b   :  { %1769 = vmatpush3.bf16.msra.mxu0 %v1833_v11 }
 0x77c   :  { %1770 = vmatprep.subr.bf16.mxu0 %v2630_v56 }
 0x77f   :  { %1771 = vmatpush3.bf16.msra.mxu0 %v1834_v13 }
 0x780   :  { %1772 = vmatprep.subr.bf16.mxu0 %v2630_v56 }
 0x783   :  { %1773 = vmatpush3.bf16.msra.mxu0 %v1835_v14 }
 0x784   :  { %1774 = vmatprep.subr.bf16.mxu0 %v2630_v56 }
 0x787   :  { %1775 = vmatpush3.bf16.msra.mxu0 %v1836_v18 }
 0x788   :  { %1776 = vmatprep.subr.bf16.mxu0 %v2630_v56 }
 0x78b   :  { %1777 = vmatpush3.bf16.msra.mxu0 %v1837_v19 }
 0x78c   :  { %1778 = vmatprep.subr.bf16.mxu0 %v2630_v56 }
 0x78f   :  { %1779 = vmatpush3.bf16.msra.mxu0 %v1838_v2 }
 0x790   :  { %1780 = vmatprep.subr.bf16.mxu0 %v2630_v56 }
 0x793   :  { %1781 = vmatpush3.bf16.msra.mxu0 %v1839_v42 }
 0x849   :  { %v1260_v59 = vpop.f32.mrb[44].mxu0  ;;  %v1301_v41 = vpop.f32.mrb[36].mxu1 }
 0x84a   :  { %v1261_v36 = vadd.f32 %v1260_v59, %v2260_v0  ;;  %v1262_v55 = vpop.f32.mrb[45].mxu0  ;;  %v1764_v44 = vpop.f32.mrb[37].mxu1 }
 0x84b   :  { %v1263_v61 = vadd.f32 %v1262_v55, %v2262_v53  ;;  %v1264_v35 = vpop.f32.mrb[46].mxu0  ;;  %v1304_v1 = vpop.f32.mrb[38].mxu1  ;;  %v1302_v53 = vadd.f32 %v1301_v41, %v2268_v43  ;;  %v1501_v43 = vld [vmem:[%s2612_s7] ss:$0 sm:$0xff] }
 0x84c   :  { %v1307_v31 = vadd.f32 %v1261_v36, %v2638_v60  ;;  %v1265_v22 = vpop.f32.mrb[47].mxu0  ;;  %v1765_v38 = vpop.f32.mrb[39].mxu1 }
 0x84d   :  { %v1313_v63 = vadd.f32 %v1263_v61, %v2639_v58 }
 0x84e   :  { %v1308_v9 = vsub.f32 0.0, %v1307_v31 }
 0x84f   :  { %v1314_v56 = vsub.f32 0.0, %v1313_v63 }
 0x850   :  { %v1309_v62 = vmul.f32 1.442695, %v1308_v9 }
 0x851   :  { %v1315_v4 = vmul.f32 1.442695, %v1314_v56 }
 0x852   :  { %1910 = vpow2.f32 %v1309_v62 }
 0x853   :  { %1912 = vpow2.f32 %v1315_v4 }
 0x85c   :  { %v1911_v3 = vpop.eup %1910 }
 0x85d   :  { %v1311_v0 = vadd.f32 1.0, %v1911_v3  ;;  %v1913_v12 = vpop.eup %1912 }
 0x85e   :  { %v1317_v29 = vadd.f32 1.0, %v1913_v12 }
 0x85f   :  { %1914 = vrcp.f32 %v1311_v0 }
 0x860   :  { %1916 = vrcp.f32 %v1317_v29 }
 0x869   :  { %v1915_v45 = vpop.eup %1914 }
 0x86a   :  { %v1319_v47 = vmul.f32 %v1915_v45, %v1302_v53  ;;  %v1917_v37 = vpop.eup %1916 }
 0x86b   :  { %v1322_v15 = vsub.f32 1.0, %v1917_v37  ;;  %v1324_v20 = vmul.f32 %v1917_v37, %v1218_v7 }
 0x86c   :  { %v1320_v46 = vadd.f32 %v1319_v47, %v2640_v51 }
 0x86e   :  { %1918 = vtanh.f32 %v1320_v46 }
 0x878   :  { %v1919_v39 = vpop.eup %1918 }
 0x879   :  { %v1323_v50 = vmul.f32 %v1919_v39, %v1322_v15 }
 0x87b   :  { %v1325_v54 = vadd.f32 %v1324_v20, %v1323_v50 }
 0x87d   :  { %v1331_v25 = vmax.f32 %v1325_v54, 0.0  ;;  %1445 = vst [vmem:[%s2614_s9] sm:$0xff] %v1325_v54 }
 0x87f   :  { %v1332_v21 = vpack.c.bf16 %v1331_v25, %v1331_v25 }
 0x881   :  { %1783 = vmatmul.mubr.bf16.vlgmr.msra.gmra.mrb[48].mxu0 %v1332_v21 }
 0x954   :  { %v1438_v23 = vpop.f32.mrb[48].mxu0 }
 0x955   :  { %v1439_v27 = vadd.f32 %v1501_v43, %v1438_v23  ;;  %v1784_v30 = vpop.f32.mrb[49].mxu0 }
 0x956   :  { %v1441_v24 = vpop.f32.mrb[50].mxu0 }
 0x957   :  { %1444 = vst [vmem:[%s2613_s8] sm:$0xff] %v1439_v27  ;;  %v1785_v32 = vpop.f32.mrb[51].mxu0 }
 0x958   :  { %1454 = vsyncpa [#allocation5], 1 }

</bundles_post_ra>
